<compile_context>
chip_gen: v5e
topology: v5e:2x2
jax: 0.10.0
libtpu: 0.0.40
codegen_flags: <defaults>
</compile_context>

<pallas_src>
import functools

import jax
import jax.numpy as jnp
from jax.experimental import pallas as pl
from jax.experimental.pallas import tpu as pltpu


def dft_matrix(n):
    """Orthonormal DFT matrix F[j,k] = exp(-2*pi*i*j*k/n)/sqrt(n), as (real, imag)."""
    j = jnp.arange(n, dtype=jnp.float32)
    ang = 2.0 * jnp.pi * jnp.outer(j, j) / n
    scale = 1.0 / jnp.sqrt(jnp.float32(n))
    return jnp.cos(ang) * scale, -jnp.sin(ang) * scale


def _ata_kernel(lam_ref, img_ref, csm_ref, m_ref, f_ref, out_ref, *, C, Bt, H, W):
    """One Bt-sized batch block per grid step.

    Block layouts (leading size-1 grid dim dropped):
      img : (Bt*H, 2W)    f32, [re | im] along lanes, batches stacked along rows
      csm : (Bt*C*H, 2W)  f32, [re | im] along lanes, row blocks ordered
                          coil-major / batch-minor (block j = c*Bt + b)
      m   : (H, Bt*W)     f32 k-space mask, batches stacked along lanes
      f   : (H, 2H)       bf16, [Fr | Fi] of the orthonormal DFT matrix (H == W)
      out : (Bt*H, 2W)    f32, [re | im] along lanes
    """
    NB = Bt * C
    BH = Bt * H

    lam = lam_ref[0]
    img = img_ref[0]
    pr, pi = img[:, :W], img[:, W:]                 # (BH, W)
    csm = csm_ref[0]
    cr, ci = csm[:, :W], csm[:, W:]                 # (NB*H, W)
    m = m_ref[0]                                    # (H, Bt*W)
    f = f_ref[...]
    Fr, Fi = f[:, :H], f[:, H:]                     # (H, H) bf16
    Fni = -Fi                                       # imag part of conj(F)

    def cmm(ar, ai, br, bi):
        # (ar + i*ai) @ (br + i*bi): 4 bf16 MXU matmuls, f32 accumulation.
        ar = ar.astype(jnp.bfloat16)
        ai = ai.astype(jnp.bfloat16)
        br = br.astype(jnp.bfloat16)
        bi = bi.astype(jnp.bfloat16)
        rr = (jnp.dot(ar, br, preferred_element_type=jnp.float32)
              - jnp.dot(ai, bi, preferred_element_type=jnp.float32))
        ii = (jnp.dot(ar, bi, preferred_element_type=jnp.float32)
              + jnp.dot(ai, br, preferred_element_type=jnp.float32))
        return rr, ii

    # TODO(synk): swap slice+concat for pltpu.einshape once the grouped
    # "(j h) w -> h (j w)" equation form is confirmed supported.
    def rows_to_cols(x):                            # (NB*H, W) -> (H, NB*W)
        return jnp.concatenate([x[j * H:(j + 1) * H, :] for j in range(NB)], axis=1)

    def cols_to_rows(x):                            # (H, NB*W) -> (NB*H, W)
        return jnp.concatenate([x[:, j * W:(j + 1) * W] for j in range(NB)], axis=0)

    # 1) coil images  S_{b,c} = csm_{b,c} * p_b  (broadcast over coils, f32 VPU)
    cr3 = cr.reshape(C, BH, W)
    ci3 = ci.reshape(C, BH, W)
    sr = (cr3 * pr - ci3 * pi).reshape(NB * H, W)
    si = (cr3 * pi + ci3 * pr).reshape(NB * H, W)

    # 2) fwd FFT along W (right multiply): one wide matmul, M = NB*H
    ur, ui = cmm(sr, si, Fr, Fi)

    # 3) fwd FFT along H (left multiply, cols layout): N = NB*W
    ur_c, ui_c = rows_to_cols(ur), rows_to_cols(ui)
    tr, ti = cmm(Fr, Fi, ur_c, ui_c)

    # 4) k-space mask, broadcast over coils in-kernel (binary mask: M^H M == M)
    mc = jnp.tile(m, (1, C))                        # (H, NB*W), block order (c, b)
    kr, ki = tr * mc, ti * mc

    # 5) adj FFT along H:  conj(F) @ K  (cols layout)
    vr, vi = cmm(Fr, Fni, kr, ki)

    # 6) adj FFT along W:  V @ conj(F)  (rows layout)
    vr_r, vi_r = cols_to_rows(vr), cols_to_rows(vi)
    xr, xi = cmm(vr_r, vi_r, Fr, Fni)

    # 7) coil combine  y_b = sum_c conj(csm_{b,c}) * X_{b,c}
    xr3 = xr.reshape(C, BH, W)
    xi3 = xi.reshape(C, BH, W)
    yr = jnp.sum(cr3 * xr3 + ci3 * xi3, axis=0)     # (BH, W)
    yi = jnp.sum(cr3 * xi3 - ci3 * xr3, axis=0)

    # 8) + lam * p ; lane-packed [ re | im ] store
    out_ref[0] = jnp.concatenate([yr + lam * pr, yi + lam * pi], axis=1)


def _pick_bt(B, C, H):
    """Largest divisor of B that keeps the fused MXU M dim (bt*C*H) <= ~512."""
    cap = max(1, 512 // (C * H))
    bt = 1
    for d in range(1, B + 1):
        if B % d == 0 and d <= cap:
            bt = d
    return bt


def my_ata_apply(im, csm, mask, lam, *, bt=None):
    """myAtA.forward:  A.adj(A.fwd(im)) + lam * im.

    im   : (B, H, W)    complex64
    csm  : (B, C, H, W) complex64
    mask : (B, H, W)    {0,1} (any real/int dtype)
    lam  : scalar
    returns (B, H, W) complex64
    """
    B, H, W = im.shape
    C = csm.shape[1]
    assert H == W, "square images assumed (single DFT matrix)"
    if bt is None:
        bt = _pick_bt(B, C, H)
    assert B % bt == 0
    G = B // bt

    # image: [re | im] packed along lanes, bt batches stacked along rows per step
    img_p = jnp.concatenate([jnp.real(im), jnp.imag(im)], axis=-1)
    img_p = img_p.astype(jnp.float32).reshape(G, bt * H, 2 * W)

    # csm: [re | im] along lanes, row blocks ordered coil-major / batch-minor
    csm_p = jnp.concatenate([jnp.real(csm), jnp.imag(csm)], axis=-1)   # (B,C,H,2W)
    csm_p = csm_p.astype(jnp.float32).reshape(G, bt, C, H, 2 * W)
    csm_p = jnp.transpose(csm_p, (0, 2, 1, 3, 4)).reshape(G, C * bt * H, 2 * W)

    # mask: one copy per image (no xC host tiling), batches stacked along lanes
    m_p = mask.astype(jnp.float32).reshape(G, bt, H, W)
    m_p = jnp.transpose(m_p, (0, 2, 1, 3)).reshape(G, H, bt * W)

    # bf16 DFT matrix, [Fr | Fi] packed along lanes
    Fr, Fi = dft_matrix(H)
    f_p = jnp.concatenate([Fr, Fi], axis=1).astype(jnp.bfloat16)       # (H, 2H)

    lam_arr = jnp.reshape(jnp.asarray(lam, jnp.float32), (1,))

    # VMEM budget: double-buffered I/O blocks + ~24 live f32 intermediate slabs.
    nb = bt * C
    io_bytes = 2 * (2 * (bt * H * 2 * W * 4) + nb * H * 2 * W * 4
                    + H * bt * W * 4 + H * 2 * H * 2)
    scratch_bytes = 24 * nb * H * W * 4
    vmem_limit = int(min(48 * 2 ** 20,
                         max(16 * 2 ** 20, 2 * (io_bytes + scratch_bytes))))

    kern = functools.partial(_ata_kernel, C=C, Bt=bt, H=H, W=W)
    # TODO(synk): at production sizes where bt*C*H*W slabs no longer fit the
    # v7x 64 MiB VMEM, add a coil grid axis ("arbitrary") with a VMEM accumulator.
    packed = pl.pallas_call(
        kern,
        grid=(G,),
        in_specs=[
            pl.BlockSpec(memory_space=pltpu.MemorySpace.SMEM),          # lam
            pl.BlockSpec((1, bt * H, 2 * W), lambda g: (g, 0, 0)),      # image
            pl.BlockSpec((1, C * bt * H, 2 * W), lambda g: (g, 0, 0)),  # csm
            pl.BlockSpec((1, H, bt * W), lambda g: (g, 0, 0)),          # mask
            pl.BlockSpec((H, 2 * H), lambda g: (0, 0)),                 # DFT matrix
        ],
        out_specs=pl.BlockSpec((1, bt * H, 2 * W), lambda g: (g, 0, 0)),
        out_shape=jax.ShapeDtypeStruct((G, bt * H, 2 * W), jnp.float32),
        compiler_params=pltpu.CompilerParams(
            dimension_semantics=("parallel",),
            vmem_limit_bytes=vmem_limit),
    )(lam_arr, img_p, csm_p, m_p, f_p)

    out_r = packed[:, :, :W].reshape(B, H, W)
    out_i = packed[:, :, W:].reshape(B, H, W)
    return (out_r + 1j * out_i).astype(jnp.complex64)


if __name__ == "__main__":
    B, C, H, W = 2, 4, 16, 16
    k1, k2, k3, k4, k5 = jax.random.split(jax.random.PRNGKey(0), 5)
    im = (jax.random.normal(k1, (B, H, W), jnp.float32)
          + 1j * jax.random.normal(k2, (B, H, W), jnp.float32)).astype(jnp.complex64)
    csm = (0.5 * jax.random.normal(k3, (B, C, H, W), jnp.float32)
           + 1j * 0.5 * jax.random.normal(k4, (B, C, H, W), jnp.float32)
           ).astype(jnp.complex64)
    mask = (jax.random.uniform(k5, (B, H, W)) > 0.5).astype(jnp.float32)
    lam = jnp.float32(0.05)

    out = jax.jit(my_ata_apply)(im, csm, mask, lam)
    jax.block_until_ready(out)

    # pure-JAX reference with the same (unshifted, orthonormal) FFT convention
    def reference(im, csm, mask, lam):
        coil = csm * im[:, None]
        k = jnp.fft.fft2(coil, norm="ortho") * mask[:, None]
        x = jnp.fft.ifft2(k, norm="ortho")
        return jnp.sum(jnp.conj(csm) * x, axis=1) + lam * im

    expect = reference(im, csm, mask, lam)

    assert out.shape == (B, H, W) and out.dtype == jnp.complex64
    assert bool(jnp.all(jnp.isfinite(jnp.abs(out))))
    # bf16 MXU operands (f32 accumulation) -> relative accuracy ~1e-2.
    rel = float(jnp.linalg.norm(out - expect) / jnp.linalg.norm(expect))
    assert rel < 3e-2, rel
    print("KERNEL_OK")
</pallas_src>

<mosaic_0001>
module attributes {stable_mosaic.version = 11 : i64} {
  func.func @_ata_kernel(%arg0: i32, %arg1: memref<1xf32, #tpu.memory_space<smem>>, %arg2: memref<1x32x32xf32, #tpu.memory_space<vmem>>, %arg3: memref<1x128x32xf32, #tpu.memory_space<vmem>>, %arg4: memref<1x16x32xf32, #tpu.memory_space<vmem>>, %arg5: memref<16x32xbf16, #tpu.memory_space<vmem>>, %arg6: memref<1x32x32xf32, #tpu.memory_space<vmem>>) attributes {dimension_semantics = [#tpu.dimension_semantics<parallel>], iteration_bounds = array<i64: 1>, scalar_prefetch = 0 : i64, scratch_operands = 0 : i64, tpu.core_type = #tpu.core_type<tc>, window_params = [{transform_indices = @transform_0, window_bounds = array<i64: 1>}, {transform_indices = @transform_1, window_bounds = array<i64: 1, 32, 32>}, {transform_indices = @transform_2, window_bounds = array<i64: 1, 128, 32>}, {transform_indices = @transform_3, window_bounds = array<i64: 1, 16, 32>}, {pipeline_mode = #tpu.pipeline_mode<synchronous>, transform_indices = @transform_4, window_bounds = array<i64: 16, 32>}, {transform_indices = @transform_5, window_bounds = array<i64: 1, 32, 32>}]} {
    %c0 = arith.constant 0 : index
    %0 = memref.load %arg1[%c0] : memref<1xf32, #tpu.memory_space<smem>>
    %c0_0 = arith.constant 0 : index
    %c0_1 = arith.constant 0 : index
    %c0_2 = arith.constant 0 : index
    %1 = vector.load %arg2[%c0_0, %c0_1, %c0_2] : memref<1x32x32xf32, #tpu.memory_space<vmem>>, vector<1x32x32xf32>
    %2 = vector.shape_cast %1 : vector<1x32x32xf32> to vector<32x32xf32>
    %3 = vector.extract_strided_slice %2 {offsets = [0, 0], sizes = [32, 16], strides = [1, 1]} : vector<32x32xf32> to vector<32x16xf32>
    %4 = vector.extract_strided_slice %2 {offsets = [0, 16], sizes = [32, 16], strides = [1, 1]} : vector<32x32xf32> to vector<32x16xf32>
    %c0_3 = arith.constant 0 : index
    %c0_4 = arith.constant 0 : index
    %c0_5 = arith.constant 0 : index
    %5 = vector.load %arg3[%c0_3, %c0_4, %c0_5] : memref<1x128x32xf32, #tpu.memory_space<vmem>>, vector<1x128x32xf32>
    %6 = vector.shape_cast %5 : vector<1x128x32xf32> to vector<128x32xf32>
    %7 = vector.extract_strided_slice %6 {offsets = [0, 0], sizes = [128, 16], strides = [1, 1]} : vector<128x32xf32> to vector<128x16xf32>
    %8 = vector.extract_strided_slice %6 {offsets = [0, 16], sizes = [128, 16], strides = [1, 1]} : vector<128x32xf32> to vector<128x16xf32>
    %c0_6 = arith.constant 0 : index
    %c0_7 = arith.constant 0 : index
    %c0_8 = arith.constant 0 : index
    %9 = vector.load %arg4[%c0_6, %c0_7, %c0_8] : memref<1x16x32xf32, #tpu.memory_space<vmem>>, vector<1x16x32xf32>
    %10 = vector.shape_cast %9 : vector<1x16x32xf32> to vector<16x32xf32>
    %c0_9 = arith.constant 0 : index
    %c0_10 = arith.constant 0 : index
    %11 = vector.load %arg5[%c0_9, %c0_10] : memref<16x32xbf16, #tpu.memory_space<vmem>>, vector<16x32xbf16>
    %12 = vector.extract_strided_slice %11 {offsets = [0, 0], sizes = [16, 16], strides = [1, 1]} : vector<16x32xbf16> to vector<16x16xbf16>
    %13 = vector.extract_strided_slice %11 {offsets = [0, 16], sizes = [16, 16], strides = [1, 1]} : vector<16x32xbf16> to vector<16x16xbf16>
    %cst = arith.constant 0.000000e+00 : bf16
    %14 = vector.broadcast %cst : bf16 to vector<16x16xbf16>
    %15 = arith.subf %14, %13 : vector<16x16xbf16>
    %16 = vector.shape_cast %7 : vector<128x16xf32> to vector<4x32x16xf32>
    %17 = vector.shape_cast %8 : vector<128x16xf32> to vector<4x32x16xf32>
    %18 = vector.shape_cast %3 : vector<32x16xf32> to vector<1x32x16xf32>
    %19 = vector.broadcast %18 : vector<1x32x16xf32> to vector<4x32x16xf32>
    %20 = arith.mulf %16, %19 : vector<4x32x16xf32>
    %21 = vector.shape_cast %4 : vector<32x16xf32> to vector<1x32x16xf32>
    %22 = vector.broadcast %21 : vector<1x32x16xf32> to vector<4x32x16xf32>
    %23 = arith.mulf %17, %22 : vector<4x32x16xf32>
    %24 = arith.subf %20, %23 : vector<4x32x16xf32>
    %25 = vector.shape_cast %24 : vector<4x32x16xf32> to vector<128x16xf32>
    %26 = vector.shape_cast %4 : vector<32x16xf32> to vector<1x32x16xf32>
    %27 = vector.broadcast %26 : vector<1x32x16xf32> to vector<4x32x16xf32>
    %28 = arith.mulf %16, %27 : vector<4x32x16xf32>
    %29 = vector.shape_cast %3 : vector<32x16xf32> to vector<1x32x16xf32>
    %30 = vector.broadcast %29 : vector<1x32x16xf32> to vector<4x32x16xf32>
    %31 = arith.mulf %17, %30 : vector<4x32x16xf32>
    %32 = arith.addf %28, %31 : vector<4x32x16xf32>
    %33 = vector.shape_cast %32 : vector<4x32x16xf32> to vector<128x16xf32>
    %34 = arith.truncf %25 : vector<128x16xf32> to vector<128x16xbf16>
    %35 = arith.truncf %33 : vector<128x16xf32> to vector<128x16xbf16>
    %cst_11 = arith.constant dense<0.000000e+00> : vector<128x16xf32>
    %36 = tpu.matmul %34, %12, %cst_11 {dimension_numbers = #tpu.dot_dimension_numbers<[1], [0], [0], [1], [0, 0, 1, 1], [], []>} : vector<128x16xbf16>, vector<16x16xbf16>, vector<128x16xf32> -> vector<128x16xf32>
    %cst_12 = arith.constant dense<0.000000e+00> : vector<128x16xf32>
    %37 = tpu.matmul %35, %13, %cst_12 {dimension_numbers = #tpu.dot_dimension_numbers<[1], [0], [0], [1], [0, 0, 1, 1], [], []>} : vector<128x16xbf16>, vector<16x16xbf16>, vector<128x16xf32> -> vector<128x16xf32>
    %38 = arith.subf %36, %37 : vector<128x16xf32>
    %cst_13 = arith.constant dense<0.000000e+00> : vector<128x16xf32>
    %39 = tpu.matmul %34, %13, %cst_13 {dimension_numbers = #tpu.dot_dimension_numbers<[1], [0], [0], [1], [0, 0, 1, 1], [], []>} : vector<128x16xbf16>, vector<16x16xbf16>, vector<128x16xf32> -> vector<128x16xf32>
    %cst_14 = arith.constant dense<0.000000e+00> : vector<128x16xf32>
    %40 = tpu.matmul %35, %12, %cst_14 {dimension_numbers = #tpu.dot_dimension_numbers<[1], [0], [0], [1], [0, 0, 1, 1], [], []>} : vector<128x16xbf16>, vector<16x16xbf16>, vector<128x16xf32> -> vector<128x16xf32>
    %41 = arith.addf %39, %40 : vector<128x16xf32>
    %42 = vector.extract_strided_slice %38 {offsets = [0, 0], sizes = [16, 16], strides = [1, 1]} : vector<128x16xf32> to vector<16x16xf32>
    %43 = vector.extract_strided_slice %38 {offsets = [16, 0], sizes = [16, 16], strides = [1, 1]} : vector<128x16xf32> to vector<16x16xf32>
    %44 = vector.extract_strided_slice %38 {offsets = [32, 0], sizes = [16, 16], strides = [1, 1]} : vector<128x16xf32> to vector<16x16xf32>
    %45 = vector.extract_strided_slice %38 {offsets = [48, 0], sizes = [16, 16], strides = [1, 1]} : vector<128x16xf32> to vector<16x16xf32>
    %46 = vector.extract_strided_slice %38 {offsets = [64, 0], sizes = [16, 16], strides = [1, 1]} : vector<128x16xf32> to vector<16x16xf32>
    %47 = vector.extract_strided_slice %38 {offsets = [80, 0], sizes = [16, 16], strides = [1, 1]} : vector<128x16xf32> to vector<16x16xf32>
    %48 = vector.extract_strided_slice %38 {offsets = [96, 0], sizes = [16, 16], strides = [1, 1]} : vector<128x16xf32> to vector<16x16xf32>
    %49 = vector.extract_strided_slice %38 {offsets = [112, 0], sizes = [16, 16], strides = [1, 1]} : vector<128x16xf32> to vector<16x16xf32>
    %50 = tpu.concatenate %42, %43, %44, %45, %46, %47, %48, %49 in 1 : vector<16x16xf32>, vector<16x16xf32>, vector<16x16xf32>, vector<16x16xf32>, vector<16x16xf32>, vector<16x16xf32>, vector<16x16xf32>, vector<16x16xf32> -> vector<16x128xf32>
    %51 = vector.extract_strided_slice %41 {offsets = [0, 0], sizes = [16, 16], strides = [1, 1]} : vector<128x16xf32> to vector<16x16xf32>
    %52 = vector.extract_strided_slice %41 {offsets = [16, 0], sizes = [16, 16], strides = [1, 1]} : vector<128x16xf32> to vector<16x16xf32>
    %53 = vector.extract_strided_slice %41 {offsets = [32, 0], sizes = [16, 16], strides = [1, 1]} : vector<128x16xf32> to vector<16x16xf32>
    %54 = vector.extract_strided_slice %41 {offsets = [48, 0], sizes = [16, 16], strides = [1, 1]} : vector<128x16xf32> to vector<16x16xf32>
    %55 = vector.extract_strided_slice %41 {offsets = [64, 0], sizes = [16, 16], strides = [1, 1]} : vector<128x16xf32> to vector<16x16xf32>
    %56 = vector.extract_strided_slice %41 {offsets = [80, 0], sizes = [16, 16], strides = [1, 1]} : vector<128x16xf32> to vector<16x16xf32>
    %57 = vector.extract_strided_slice %41 {offsets = [96, 0], sizes = [16, 16], strides = [1, 1]} : vector<128x16xf32> to vector<16x16xf32>
    %58 = vector.extract_strided_slice %41 {offsets = [112, 0], sizes = [16, 16], strides = [1, 1]} : vector<128x16xf32> to vector<16x16xf32>
    %59 = tpu.concatenate %51, %52, %53, %54, %55, %56, %57, %58 in 1 : vector<16x16xf32>, vector<16x16xf32>, vector<16x16xf32>, vector<16x16xf32>, vector<16x16xf32>, vector<16x16xf32>, vector<16x16xf32>, vector<16x16xf32> -> vector<16x128xf32>
    %60 = arith.truncf %50 : vector<16x128xf32> to vector<16x128xbf16>
    %61 = arith.truncf %59 : vector<16x128xf32> to vector<16x128xbf16>
    %cst_15 = arith.constant dense<0.000000e+00> : vector<16x128xf32>
    %62 = tpu.matmul %12, %60, %cst_15 {dimension_numbers = #tpu.dot_dimension_numbers<[1], [0], [0], [1], [0, 0, 1, 1], [], []>} : vector<16x16xbf16>, vector<16x128xbf16>, vector<16x128xf32> -> vector<16x128xf32>
    %cst_16 = arith.constant dense<0.000000e+00> : vector<16x128xf32>
    %63 = tpu.matmul %13, %61, %cst_16 {dimension_numbers = #tpu.dot_dimension_numbers<[1], [0], [0], [1], [0, 0, 1, 1], [], []>} : vector<16x16xbf16>, vector<16x128xbf16>, vector<16x128xf32> -> vector<16x128xf32>
    %64 = arith.subf %62, %63 : vector<16x128xf32>
    %cst_17 = arith.constant dense<0.000000e+00> : vector<16x128xf32>
    %65 = tpu.matmul %12, %61, %cst_17 {dimension_numbers = #tpu.dot_dimension_numbers<[1], [0], [0], [1], [0, 0, 1, 1], [], []>} : vector<16x16xbf16>, vector<16x128xbf16>, vector<16x128xf32> -> vector<16x128xf32>
    %cst_18 = arith.constant dense<0.000000e+00> : vector<16x128xf32>
    %66 = tpu.matmul %13, %60, %cst_18 {dimension_numbers = #tpu.dot_dimension_numbers<[1], [0], [0], [1], [0, 0, 1, 1], [], []>} : vector<16x16xbf16>, vector<16x128xbf16>, vector<16x128xf32> -> vector<16x128xf32>
    %67 = arith.addf %65, %66 : vector<16x128xf32>
    %68 = tpu.concatenate %10, %10, %10, %10 in 1 : vector<16x32xf32>, vector<16x32xf32>, vector<16x32xf32>, vector<16x32xf32> -> vector<16x128xf32>
    %69 = arith.mulf %64, %68 : vector<16x128xf32>
    %70 = arith.mulf %67, %68 : vector<16x128xf32>
    %71 = arith.truncf %69 : vector<16x128xf32> to vector<16x128xbf16>
    %72 = arith.truncf %70 : vector<16x128xf32> to vector<16x128xbf16>
    %cst_19 = arith.constant dense<0.000000e+00> : vector<16x128xf32>
    %73 = tpu.matmul %12, %71, %cst_19 {dimension_numbers = #tpu.dot_dimension_numbers<[1], [0], [0], [1], [0, 0, 1, 1], [], []>} : vector<16x16xbf16>, vector<16x128xbf16>, vector<16x128xf32> -> vector<16x128xf32>
    %cst_20 = arith.constant dense<0.000000e+00> : vector<16x128xf32>
    %74 = tpu.matmul %15, %72, %cst_20 {dimension_numbers = #tpu.dot_dimension_numbers<[1], [0], [0], [1], [0, 0, 1, 1], [], []>} : vector<16x16xbf16>, vector<16x128xbf16>, vector<16x128xf32> -> vector<16x128xf32>
    %75 = arith.subf %73, %74 : vector<16x128xf32>
    %cst_21 = arith.constant dense<0.000000e+00> : vector<16x128xf32>
    %76 = tpu.matmul %12, %72, %cst_21 {dimension_numbers = #tpu.dot_dimension_numbers<[1], [0], [0], [1], [0, 0, 1, 1], [], []>} : vector<16x16xbf16>, vector<16x128xbf16>, vector<16x128xf32> -> vector<16x128xf32>
    %cst_22 = arith.constant dense<0.000000e+00> : vector<16x128xf32>
    %77 = tpu.matmul %15, %71, %cst_22 {dimension_numbers = #tpu.dot_dimension_numbers<[1], [0], [0], [1], [0, 0, 1, 1], [], []>} : vector<16x16xbf16>, vector<16x128xbf16>, vector<16x128xf32> -> vector<16x128xf32>
    %78 = arith.addf %76, %77 : vector<16x128xf32>
    %79 = vector.extract_strided_slice %75 {offsets = [0, 0], sizes = [16, 16], strides = [1, 1]} : vector<16x128xf32> to vector<16x16xf32>
    %80 = vector.extract_strided_slice %75 {offsets = [0, 16], sizes = [16, 16], strides = [1, 1]} : vector<16x128xf32> to vector<16x16xf32>
    %81 = vector.extract_strided_slice %75 {offsets = [0, 32], sizes = [16, 16], strides = [1, 1]} : vector<16x128xf32> to vector<16x16xf32>
    %82 = vector.extract_strided_slice %75 {offsets = [0, 48], sizes = [16, 16], strides = [1, 1]} : vector<16x128xf32> to vector<16x16xf32>
    %83 = vector.extract_strided_slice %75 {offsets = [0, 64], sizes = [16, 16], strides = [1, 1]} : vector<16x128xf32> to vector<16x16xf32>
    %84 = vector.extract_strided_slice %75 {offsets = [0, 80], sizes = [16, 16], strides = [1, 1]} : vector<16x128xf32> to vector<16x16xf32>
    %85 = vector.extract_strided_slice %75 {offsets = [0, 96], sizes = [16, 16], strides = [1, 1]} : vector<16x128xf32> to vector<16x16xf32>
    %86 = vector.extract_strided_slice %75 {offsets = [0, 112], sizes = [16, 16], strides = [1, 1]} : vector<16x128xf32> to vector<16x16xf32>
    %87 = tpu.concatenate %79, %80, %81, %82, %83, %84, %85, %86 in 0 : vector<16x16xf32>, vector<16x16xf32>, vector<16x16xf32>, vector<16x16xf32>, vector<16x16xf32>, vector<16x16xf32>, vector<16x16xf32>, vector<16x16xf32> -> vector<128x16xf32>
    %88 = vector.extract_strided_slice %78 {offsets = [0, 0], sizes = [16, 16], strides = [1, 1]} : vector<16x128xf32> to vector<16x16xf32>
    %89 = vector.extract_strided_slice %78 {offsets = [0, 16], sizes = [16, 16], strides = [1, 1]} : vector<16x128xf32> to vector<16x16xf32>
    %90 = vector.extract_strided_slice %78 {offsets = [0, 32], sizes = [16, 16], strides = [1, 1]} : vector<16x128xf32> to vector<16x16xf32>
    %91 = vector.extract_strided_slice %78 {offsets = [0, 48], sizes = [16, 16], strides = [1, 1]} : vector<16x128xf32> to vector<16x16xf32>
    %92 = vector.extract_strided_slice %78 {offsets = [0, 64], sizes = [16, 16], strides = [1, 1]} : vector<16x128xf32> to vector<16x16xf32>
    %93 = vector.extract_strided_slice %78 {offsets = [0, 80], sizes = [16, 16], strides = [1, 1]} : vector<16x128xf32> to vector<16x16xf32>
    %94 = vector.extract_strided_slice %78 {offsets = [0, 96], sizes = [16, 16], strides = [1, 1]} : vector<16x128xf32> to vector<16x16xf32>
    %95 = vector.extract_strided_slice %78 {offsets = [0, 112], sizes = [16, 16], strides = [1, 1]} : vector<16x128xf32> to vector<16x16xf32>
    %96 = tpu.concatenate %88, %89, %90, %91, %92, %93, %94, %95 in 0 : vector<16x16xf32>, vector<16x16xf32>, vector<16x16xf32>, vector<16x16xf32>, vector<16x16xf32>, vector<16x16xf32>, vector<16x16xf32>, vector<16x16xf32> -> vector<128x16xf32>
    %97 = arith.truncf %87 : vector<128x16xf32> to vector<128x16xbf16>
    %98 = arith.truncf %96 : vector<128x16xf32> to vector<128x16xbf16>
    %cst_23 = arith.constant dense<0.000000e+00> : vector<128x16xf32>
    %99 = tpu.matmul %97, %12, %cst_23 {dimension_numbers = #tpu.dot_dimension_numbers<[1], [0], [0], [1], [0, 0, 1, 1], [], []>} : vector<128x16xbf16>, vector<16x16xbf16>, vector<128x16xf32> -> vector<128x16xf32>
    %cst_24 = arith.constant dense<0.000000e+00> : vector<128x16xf32>
    %100 = tpu.matmul %98, %15, %cst_24 {dimension_numbers = #tpu.dot_dimension_numbers<[1], [0], [0], [1], [0, 0, 1, 1], [], []>} : vector<128x16xbf16>, vector<16x16xbf16>, vector<128x16xf32> -> vector<128x16xf32>
    %101 = arith.subf %99, %100 : vector<128x16xf32>
    %cst_25 = arith.constant dense<0.000000e+00> : vector<128x16xf32>
    %102 = tpu.matmul %97, %15, %cst_25 {dimension_numbers = #tpu.dot_dimension_numbers<[1], [0], [0], [1], [0, 0, 1, 1], [], []>} : vector<128x16xbf16>, vector<16x16xbf16>, vector<128x16xf32> -> vector<128x16xf32>
    %cst_26 = arith.constant dense<0.000000e+00> : vector<128x16xf32>
    %103 = tpu.matmul %98, %12, %cst_26 {dimension_numbers = #tpu.dot_dimension_numbers<[1], [0], [0], [1], [0, 0, 1, 1], [], []>} : vector<128x16xbf16>, vector<16x16xbf16>, vector<128x16xf32> -> vector<128x16xf32>
    %104 = arith.addf %102, %103 : vector<128x16xf32>
    %105 = vector.shape_cast %101 : vector<128x16xf32> to vector<4x32x16xf32>
    %106 = vector.shape_cast %104 : vector<128x16xf32> to vector<4x32x16xf32>
    %107 = arith.mulf %16, %105 : vector<4x32x16xf32>
    %108 = arith.mulf %17, %106 : vector<4x32x16xf32>
    %109 = arith.addf %107, %108 : vector<4x32x16xf32>
    %cst_27 = arith.constant dense<0.000000e+00> : vector<32x16xf32>
    %110 = vector.multi_reduction <add>, %109, %cst_27 [0] : vector<4x32x16xf32> to vector<32x16xf32>
    %111 = arith.mulf %16, %106 : vector<4x32x16xf32>
    %112 = arith.mulf %17, %105 : vector<4x32x16xf32>
    %113 = arith.subf %111, %112 : vector<4x32x16xf32>
    %cst_28 = arith.constant dense<0.000000e+00> : vector<32x16xf32>
    %114 = vector.multi_reduction <add>, %113, %cst_28 [0] : vector<4x32x16xf32> to vector<32x16xf32>
    %115 = vector.broadcast %0 : f32 to vector<32x16xf32>
    %116 = arith.mulf %115, %3 : vector<32x16xf32>
    %117 = arith.addf %110, %116 : vector<32x16xf32>
    %118 = vector.broadcast %0 : f32 to vector<32x16xf32>
    %119 = arith.mulf %118, %4 : vector<32x16xf32>
    %120 = arith.addf %114, %119 : vector<32x16xf32>
    %121 = tpu.concatenate %117, %120 in 1 : vector<32x16xf32>, vector<32x16xf32> -> vector<32x32xf32>
    %c0_29 = arith.constant 0 : index
    %c0_30 = arith.constant 0 : index
    %c0_31 = arith.constant 0 : index
    %122 = vector.load %arg6[%c0_29, %c0_30, %c0_31] : memref<1x32x32xf32, #tpu.memory_space<vmem>>, vector<1x32x32xf32>
    %123 = vector.shape_cast %122 : vector<1x32x32xf32> to vector<32x32xf32>
    %124 = vector.shape_cast %121 : vector<32x32xf32> to vector<1x32x32xf32>
    tpu.vector_store %arg6[%c0_29, %c0_30, %c0_31], %124 {strides = array<i32>} : memref<1x32x32xf32, #tpu.memory_space<vmem>>, vector<1x32x32xf32>,
    return
  }
  func.func @transform_0(%arg0: i32) -> i32 {
    %c0_i32 = arith.constant 0 : i32
    %c0_i32_0 = arith.constant 0 : i32
    return %c0_i32 : i32
  }
  func.func @transform_1(%arg0: i32) -> (i32, i32, i32) {
    %c0_i32 = arith.constant 0 : i32
    %c0_i32_0 = arith.constant 0 : i32
    %c0_i32_1 = arith.constant 0 : i32
    return %arg0, %c0_i32, %c0_i32_0 : i32, i32, i32
  }
  func.func @transform_2(%arg0: i32) -> (i32, i32, i32) {
    %c0_i32 = arith.constant 0 : i32
    %c0_i32_0 = arith.constant 0 : i32
    %c0_i32_1 = arith.constant 0 : i32
    return %arg0, %c0_i32, %c0_i32_0 : i32, i32, i32
  }
  func.func @transform_3(%arg0: i32) -> (i32, i32, i32) {
    %c0_i32 = arith.constant 0 : i32
    %c0_i32_0 = arith.constant 0 : i32
    %c0_i32_1 = arith.constant 0 : i32
    return %arg0, %c0_i32, %c0_i32_0 : i32, i32, i32
  }
  func.func @transform_4(%arg0: i32) -> (i32, i32) {
    %c0_i32 = arith.constant 0 : i32
    %c0_i32_0 = arith.constant 0 : i32
    %c0_i32_1 = arith.constant 0 : i32
    return %c0_i32, %c0_i32_0 : i32, i32
  }
  func.func @transform_5(%arg0: i32) -> (i32, i32, i32) {
    %c0_i32 = arith.constant 0 : i32
    %c0_i32_0 = arith.constant 0 : i32
    %c0_i32_1 = arith.constant 0 : i32
    return %arg0, %c0_i32, %c0_i32_0 : i32, i32, i32
  }
}

</mosaic_0001>

<bundles_post_ra>
// kernel: custom-call.3
= control target key start
LH: loop header
LB: loop body
LE: loop exit
PB: predicated region body
PF: predicated region fallthrough
CT: control target
= control target key end

     0   :  { %s56_s0 = inlined_call_operand.hbm [shape: c64[2,4,16,16], index: 0, kind: input, shape index: {}]   ;;  %s57_s1 = inlined_call_operand.vmem [shape: f32[2,4,16,16], index: 1, kind: output, shape index: {}]  }
   0x1   :  { %s2_s8 = scalar_lea.hbm %s56_s0, 128 }
   0x2   :  { %3 = vsyncpa [#allocation0], 0  ;;  %s5_s9 = sshll.u32 %s2_s8, 4  ;;  %s7_s12 = sshll.u32 %s57_s1, 4  ;;  %s6_s9 = int_to_ptr.hbm [resolvable:$true] %s5_s9  ;;  %s8_s12 = int_to_ptr.vmem [resolvable:$true] %s7_s12 }
   0x3   :  { %10 = dma.hbm_to_vmem [thread:$0]  %s6_s9, 2048, %s8_s12, [#allocation0] }
   0x4   :  { %38 = dma.done.wait [#allocation0], 2048  }
   0x5   :  { %39 = vsyncadd [#allocation0], 4294965248 }
   0x6   :  { %13 = vsyncpa [#allocation0], 1 }

// kernel: custom-call.2
= control target key start
LH: loop header
LB: loop body
LE: loop exit
PB: predicated region body
PF: predicated region fallthrough
CT: control target
= control target key end

     0   :  { %2 = vsyncpa [#allocation0], 0  ;;  %s55_s0 = inlined_call_operand.hbm [shape: c64[2,4,16,16], index: 0, kind: input, shape index: {}]   ;;  %s56_s1 = inlined_call_operand.vmem [shape: f32[2,4,16,16], index: 1, kind: output, shape index: {}]  }
   0x1   :  { %s4_s8 = sshll.u32 %s55_s0, 4  ;;  %s6_s11 = sshll.u32 %s56_s1, 4  ;;  %s5_s8 = int_to_ptr.hbm [resolvable:$true] %s4_s8  ;;  %s7_s11 = int_to_ptr.vmem [resolvable:$true] %s6_s11 }
   0x2   :  { %9 = dma.hbm_to_vmem [thread:$0]  %s5_s8, 2048, %s7_s11, [#allocation0] }
   0x3   :  { %37 = dma.done.wait [#allocation0], 2048  }
   0x4   :  { %38 = vsyncadd [#allocation0], 4294965248 }
   0x5   :  { %12 = vsyncpa [#allocation0], 1 }

// kernel: custom-call.1
= control target key start
LH: loop header
LB: loop body
LE: loop exit
PB: predicated region body
PF: predicated region fallthrough
CT: control target
= control target key end

     0   :  { %s56_s0 = inlined_call_operand.hbm [shape: c64[2,16,16], index: 0, kind: input, shape index: {}]   ;;  %s57_s1 = inlined_call_operand.vmem [shape: f32[2,16,16], index: 1, kind: output, shape index: {}]  }
   0x1   :  { %s2_s8 = scalar_lea.hbm %s56_s0, 32 }
   0x2   :  { %3 = vsyncpa [#allocation0], 0  ;;  %s5_s9 = sshll.u32 %s2_s8, 4  ;;  %s7_s12 = sshll.u32 %s57_s1, 4  ;;  %s6_s9 = int_to_ptr.hbm [resolvable:$true] %s5_s9  ;;  %s8_s12 = int_to_ptr.vmem [resolvable:$true] %s7_s12 }
   0x3   :  { %10 = dma.hbm_to_vmem [thread:$0]  %s6_s9, 512, %s8_s12, [#allocation0] }
   0x4   :  { %38 = dma.done.wait [#allocation0], 512  }
   0x5   :  { %39 = vsyncadd [#allocation0], 4294966784 }
   0x6   :  { %13 = vsyncpa [#allocation0], 1 }

// kernel: custom-call
= control target key start
LH: loop header
LB: loop body
LE: loop exit
PB: predicated region body
PF: predicated region fallthrough
CT: control target
= control target key end

     0   :  { %2 = vsyncpa [#allocation0], 0  ;;  %s55_s0 = inlined_call_operand.hbm [shape: c64[2,16,16], index: 0, kind: input, shape index: {}]   ;;  %s56_s1 = inlined_call_operand.vmem [shape: f32[2,16,16], index: 1, kind: output, shape index: {}]  }
   0x1   :  { %s4_s8 = sshll.u32 %s55_s0, 4  ;;  %s6_s11 = sshll.u32 %s56_s1, 4  ;;  %s5_s8 = int_to_ptr.hbm [resolvable:$true] %s4_s8  ;;  %s7_s11 = int_to_ptr.vmem [resolvable:$true] %s6_s11 }
   0x2   :  { %9 = dma.hbm_to_vmem [thread:$0]  %s5_s8, 512, %s7_s11, [#allocation0] }
   0x3   :  { %37 = dma.done.wait [#allocation0], 512  }
   0x4   :  { %38 = vsyncadd [#allocation0], 4294966784 }
   0x5   :  { %12 = vsyncpa [#allocation0], 1 }

// kernel: custom-call.4
= control target key start
LH: loop header
LB: loop body
LE: loop exit
PB: predicated region body
PF: predicated region fallthrough
CT: control target
= control target key end

     0   :  { %s105_s0 = inlined_call_operand.vmem [shape: f32[2,16,16], index: 0, kind: input, shape index: {}]   ;;  %s106_s1 = inlined_call_operand.vmem [shape: f32[2,16,16], index: 1, kind: input, shape index: {}]   ;;  %s107_s2 = inlined_call_operand.hbm [shape: c64[2,16,16], index: 2, kind: output, shape index: {}]  }
   0x1   :  { %s3_s11 = scalar_lea.hbm %s107_s2, 32 }
   0x2   :  { %4 = vsyncpa [#allocation0], 0  ;;  %s6_s14 = sshll.u32 %s105_s0, 4  ;;  %s8_s17 = sshll.u32 %s107_s2, 4  ;;  %s7_s14 = int_to_ptr.vmem [resolvable:$true] %s6_s14  ;;  %s9_s17 = int_to_ptr.hbm [resolvable:$true] %s8_s17 }
   0x3   :  { %11 = dma.vmem_to_hbm [thread:$0]  %s7_s14, 512, %s9_s17, [#allocation0] }
   0x4   :  { %74 = dma.done.wait [#allocation0], 512  }
   0x5   :  { %75 = vsyncadd [#allocation0], 4294966784 }
   0x6   :  { %14 = vsyncpa [#allocation0], 1 }
   0x7   :  { %15 = vsyncpa [#allocation1], 0  ;;  %s17_s20 = sshll.u32 %s106_s1, 4  ;;  %s19_s21 = sshll.u32 %s3_s11, 4  ;;  %s18_s20 = int_to_ptr.vmem [resolvable:$true] %s17_s20  ;;  %s20_s21 = int_to_ptr.hbm [resolvable:$true] %s19_s21 }
   0x8   :  { %22 = dma.vmem_to_hbm [thread:$0]  %s18_s20, 512, %s20_s21, [#allocation1] }
   0x9   :  { %76 = dma.done.wait [#allocation1], 512  }
   0xa   :  { %77 = vsyncadd [#allocation1], 4294966784 }
   0xb   :  { %25 = vsyncpa [#allocation1], 1 }

// kernel: my_ata_apply.1
= control target key start
LH: loop header
LB: loop body
LE: loop exit
PB: predicated region body
PF: predicated region fallthrough
CT: control target
= control target key end

     0   :  { %s1956_s22 = smov 16   ;;  %s1957_s23 = smov 112   ;;  %vm310_vm0 = vcmask 130048   ;;  %vm635_vm1 = vcmask 392192   ;;  %vm632_vm2 = vcmask 261120   ;;  %vm638_vm3 = vcmask 523264   ;;  %s3025_s1 = inlined_call_operand.vmem [shape: f32[1,32,32], index: 1, kind: input, shape index: {}]   ;;  %s3026_s4 = inlined_call_operand.vmem [shape: bf16[16,32], index: 4, kind: input, shape index: {}]   ;;  %s3027_s2 = inlined_call_operand.vmem [shape: f32[1,128,32], index: 2, kind: input, shape index: {}]   ;;  %s3028_s3 = inlined_call_operand.vmem [shape: f32[1,16,32], index: 3, kind: input, shape index: {}]   ;;  %s3029_s0 = inlined_call_operand.<no memory space> [shape: f32[1], index: 0, kind: input, shape index: {}]   ;;  %s3030_s5 = inlined_call_operand.vmem [shape: f32[1,32,32], index: 5, kind: output, shape index: {}]  }
   0x1   :  { %v1996_v0 = vld [vmem:[%s3025_s1 + $0x10] sm:$0xff]  ;;  %v2001_v1 = vld [vmem:[%s3025_s1] sm:$0xff]  ;;  %v2019_v3 = vld [vmem:[%s3025_s1 + $0x18] sm:$0xff]  ;;  %s1958_s14 = smov 32   ;;  %s1959_s15 = smov 48   ;;  %vm641_vm4 = vcmask 654336  }
   0x2   :  { %184 = vrot.lane.b32.xlu1 %v1996_v0, %s1956_s22  ;;  %180 = vrot.lane.b32.xlu0 %v2001_v1, %s1956_s22  ;;  %v2012_v2 = vld [vmem:[%s3026_s4] sm:$0xff]  ;;  %v2024_v4 = vld [vmem:[%s3025_s1 + $0x8] sm:$0xff]  ;;  %s1960_s16 = smov 64   ;;  %s1961_s17 = smov 80   ;;  %vm644_vm5 = vcmask 785408   ;;  %vm647_vm6 = vcmask 916480  }
   0x3   :  { %152 = vrot.lane.b32.xlu2 %v2001_v1, %s1957_s23  ;;  %342 = vmatpush.bf16.msra.mxu0 %v2012_v2  ;;  %v2033_v5 = vld [vmem:[%s3027_s2 + $0x8] sm:$0xff]  ;;  %v2040_v6 = vld [vmem:[%s3027_s2] sm:$0xff]  ;;  %v2059_v9 = vld [vmem:[%s3027_s2 + $0x10] sm:$0xff]  ;;  %s1962_s18 = smov 96  }
   0x4   :  { %483 = vmatpush.bf16.msra.mxu2 %v2012_v2  ;;  %v2044_v7 = vmul.f32 %v2033_v5, %v2024_v4  ;;  %v2048_v8 = vmul.f32 %v2040_v6, %v2001_v1  ;;  %v2063_v10 = vmul.f32 %v2059_v9, %v1996_v0  ;;  %v2077_v14 = vld [vmem:[%s3027_s2 + $0x18] sm:$0xff]  ;;  %v2094_v19 = vld [vmem:[%s3027_s2 + $0x20] sm:$0xff]  ;;  %v2135_v27 = vld [vmem:[%s3027_s2 + $0x28] sm:$0xff] }
   0x5   :  { %v2098_v20 = vmul.f32 %v2077_v14, %v2019_v3  ;;  %v2110_v22 = vld [vmem:[%s3027_s2 + $0x38] sm:$0xff]  ;;  %v2118_v24 = vmul.f32 %v2094_v19, %v2001_v1  ;;  %v2130_v26 = vld [vmem:[%s3027_s2 + $0x40] sm:$0xff]  ;;  %v2143_v29 = vmul.f32 %v2135_v27, %v2024_v4  ;;  %v2155_v31 = vld [vmem:[%s3027_s2 + $0x48] sm:$0xff] }
   0x6   :  { %v2114_v23 = vmul.f32 %v2110_v22, %v2019_v3  ;;  %v2139_v28 = vmul.f32 %v2130_v26, %v2001_v1  ;;  %v2160_v32 = vld [vmem:[%s3027_s2 + $0x30] sm:$0xff]  ;;  %v2181_v37 = vmul.f32 %v2155_v31, %v2024_v4  ;;  %v2194_v40 = vld [vmem:[%s3027_s2 + $0x68] sm:$0xff]  ;;  %v2219_v45 = vld [vmem:[%s3027_s2 + $0x58] sm:$0xff] }
   0x7   :  { %v2164_v33 = vmul.f32 %v2160_v32, %v1996_v0  ;;  %v2177_v36 = vld [vmem:[%s3027_s2 + $0x50] sm:$0xff]  ;;  %v2198_v41 = vmul.f32 %v2194_v40, %v2024_v4  ;;  %v2227_v48 = vmul.f32 %v2219_v45, %v2019_v3  ;;  %v2239_v50 = vld [vmem:[%s3027_s2 + $0x78] sm:$0xff]  ;;  %v2244_v51 = vld [vmem:[%s3027_s2 + $0x60] sm:$0xff] }
   0x8   :  { %v2202_v42 = vmul.f32 %v2177_v36, %v1996_v0  ;;  %v2214_v44 = vld [vmem:[%s3027_s2 + $0x70] sm:$0xff]  ;;  %v2252_v53 = vmul.f32 %v2244_v51, %v2001_v1 }
   0x9   :  { %v2223_v47 = vmul.f32 %v2214_v44, %v1996_v0 }
   0xa   :  { %186 = vrot.lane.b32.xlu1 %v2019_v3, %s1956_s22  ;;  %182 = vrot.lane.b32.xlu0 %v2024_v4, %s1956_s22 }
   0xb   :  { %154 = vrot.lane.b32.xlu2 %v2024_v4, %s1957_s23  ;;  %v2280_v4 = vmul.f32 %v2239_v50, %v2019_v3 }
  0x12   :  { %86 = vrot.lane.b32.xlu1 %v2044_v7, %s1957_s23  ;;  %84 = vrot.lane.b32.xlu0 %v2048_v8, %s1957_s23 }
  0x1a   :  { %384 = vrot.lane.b32.xlu1 %v2012_v2, %s1957_s23 }
  0x22   :  { %88 = vrot.lane.b32.xlu1 %v2063_v10, %s1957_s23 }
  0x5d   :  { %v2258_v56 = vpop.permute.xlu2 %152 }
  0x65   :  { %v2268_v62 = vpop.permute.xlu2 %154 }
  0x74   :  { %v2067_v11 = vpop.permute.xlu1 %184  ;;  %v2069_v12 = vpop.permute.xlu0 %180 }
  0x75   :  { %v192_v13 = vmul.f32 %v2069_v12, %v2040_v6  ;;  %v196_v21 = vmul.f32 %v2069_v12, %v2094_v19  ;;  %v194_v25 = vmul.f32 %v2067_v11, %v2059_v9  ;;  %v198_v35 = vmul.f32 %v2067_v11, %v2160_v32 }
  0x76   :  { %v202_v38 = vmul.f32 %v2067_v11, %v2177_v36  ;;  %v200_v43 = vmul.f32 %v2069_v12, %v2130_v26  ;;  %v204_v55 = vmul.f32 %v2069_v12, %v2244_v51  ;;  %v206_v63 = vmul.f32 %v2067_v11, %v2214_v44 }
  0x77   :  { %224 = vrot.lane.b32.xlu2 %v192_v13, %s1957_s23 }
  0x7c   :  { %v2079_v15 = vpop.permute.xlu1 %186  ;;  %v2081_v16 = vpop.permute.xlu0 %182 }
  0x7d   :  { %v195_v17 = vmul.f32 %v2079_v15, %v2077_v14  ;;  %v193_v18 = vmul.f32 %v2081_v16, %v2033_v5  ;;  %v197_v30 = vmul.f32 %v2081_v16, %v2135_v27  ;;  %v201_v34 = vmul.f32 %v2081_v16, %v2155_v31 }
  0x7e   :  { %v199_v39 = vmul.f32 %v2079_v15, %v2110_v22  ;;  %v203_v49 = vmul.f32 %v2079_v15, %v2219_v45  ;;  %v207_v54 = vmul.f32 %v2079_v15, %v2239_v50  ;;  %v205_v61 = vmul.f32 %v2081_v16, %v2194_v40 }
  0x7f   :  { %230 = vrot.lane.b32.xlu1 %v195_v17, %s1957_s23  ;;  %156 = vrot.lane.b32.xlu2 %v1996_v0, %s1957_s23  ;;  %v164_v16 = vmul.f32 %v2258_v56, %v2040_v6 }
  0x80   :  { %226 = vrot.lane.b32.xlu0 %v193_v18, %s1957_s23  ;;  %v165_v18 = vmul.f32 %v2268_v62, %v2033_v5 }
  0x84   :  { %v87_v46 = vpop.permute.xlu1 %86  ;;  %v85_v58 = vpop.permute.xlu0 %84 }
  0x85   :  { %v133_v57 = vsub.f32 %v2044_v7, %v87_v46  ;;  %v132_v59 = vsub.f32 %v2048_v8, %v85_v58 }
  0x87   :  { %232 = vrot.lane.b32.xlu1 %v196_v21, %s1957_s23  ;;  %90 = vrot.lane.b32.xlu2 %v2098_v20, %s1957_s23  ;;  %v288_v60 = vpack.c.bf16 %v133_v57, %v132_v59 }
  0x88   :  { %158 = vrot.lane.b32.xlu0 %v2019_v3, %s1957_s23 }
  0x89   :  { %1716 = vmatmul.msk.bf16.vlgmr.msra.gmra.mxu0 %vm310_vm0, %v288_v60 }
  0x8c   :  { %v2246_v52 = vpop.permute.xlu1 %384 }
  0x8d   :  { %532 = vmatpush.bf16.msra.mxu3 %v2246_v52  ;;  %418 = vmatpush.bf16.msra.mxu1 %v2246_v52 }
  0x8f   :  { %98 = vrot.lane.b32.xlu1 %v2114_v23, %s1957_s23  ;;  %92 = vrot.lane.b32.xlu2 %v2118_v24, %s1957_s23 }
  0x90   :  { %228 = vrot.lane.b32.xlu0 %v194_v25, %s1957_s23  ;;  %1740 = vmatmul.msk.bf16.vlgmr.msra.gmra.mxu3 %vm310_vm0, %v288_v60 }
  0x94   :  { %v89_v7 = vpop.permute.xlu1 %88 }
  0x95   :  { %v134_v8 = vsub.f32 %v2063_v10, %v89_v7 }
  0x97   :  { %100 = vrot.lane.b32.xlu1 %v2139_v28, %s1957_s23  ;;  %234 = vrot.lane.b32.xlu2 %v197_v30, %s1957_s23 }
  0x98   :  { %94 = vrot.lane.b32.xlu0 %v2143_v29, %s1957_s23 }
  0x9f   :  { %242 = vrot.lane.b32.xlu1 %v201_v34, %s1957_s23  ;;  %236 = vrot.lane.b32.xlu2 %v198_v35, %s1957_s23  ;;  %v168_v34 = vmul.f32 %v2258_v56, %v2094_v19 }
  0xa0   :  { %96 = vrot.lane.b32.xlu0 %v2164_v33, %s1957_s23 }
  0xa7   :  { %244 = vrot.lane.b32.xlu1 %v202_v38, %s1957_s23  ;;  %102 = vrot.lane.b32.xlu2 %v2181_v37, %s1957_s23 }
  0xa8   :  { %238 = vrot.lane.b32.xlu0 %v199_v39, %s1957_s23 }
  0xaf   :  { %110 = vrot.lane.b32.xlu1 %v2198_v41, %s1957_s23  ;;  %104 = vrot.lane.b32.xlu2 %v2202_v42, %s1957_s23 }
  0xb0   :  { %240 = vrot.lane.b32.xlu0 %v200_v43, %s1957_s23 }
  0xb7   :  { %112 = vrot.lane.b32.xlu1 %v2223_v47, %s1957_s23  ;;  %246 = vrot.lane.b32.xlu2 %v203_v49, %s1957_s23 }
  0xb8   :  { %106 = vrot.lane.b32.xlu0 %v2227_v48, %s1957_s23 }
  0xbf   :  { %254 = vrot.lane.b32.xlu1 %v207_v54, %s1957_s23  ;;  %248 = vrot.lane.b32.xlu2 %v204_v55, %s1957_s23 }
  0xc0   :  { %108 = vrot.lane.b32.xlu0 %v2252_v53, %s1957_s23 }
  0xc7   :  { %114 = vrot.lane.b32.xlu2 %v2280_v4, %s1957_s23 }
  0xc8   :  { %250 = vrot.lane.b32.xlu0 %v205_v61, %s1957_s23 }
  0xd0   :  { %252 = vrot.lane.b32.xlu0 %v206_v63, %s1957_s23 }
  0xd1   :  { %v225_v0 = vpop.permute.xlu2 %224 }
  0xd2   :  { %v272_v25 = vadd.f32 %v225_v0, %v164_v16 }
  0xd9   :  { %v2276_v1 = vpop.permute.xlu2 %156 }
  0xda   :  { %v166_v54 = vmul.f32 %v2276_v1, %v2059_v9 }
  0xe1   :  { %v91_v12 = vpop.permute.xlu2 %90 }
  0xe2   :  { %v135_v13 = vsub.f32 %v2098_v20, %v91_v12  ;;  %v169_v20 = vmul.f32 %v2268_v62, %v2135_v27 }
  0xe4   :  { %v289_v15 = vpack.c.bf16 %v135_v13, %v134_v8 }
  0xe6   :  { %1717 = vmatmul.msk.bf16.gmra.mxu0 %vm310_vm0, %v289_v15  ;;  %1741 = vmatmul.msk.bf16.gmra.mxu3 %vm310_vm0, %v289_v15 }
  0xe9   :  { %v93_v11 = vpop.permute.xlu2 %92 }
  0xea   :  { %v136_v19 = vsub.f32 %v2118_v24, %v93_v11 }
  0xf1   :  { %v231_v3 = vpop.permute.xlu1 %230  ;;  %v235_v17 = vpop.permute.xlu2 %234 }
  0xf2   :  { %v227_v21 = vpop.permute.xlu0 %226  ;;  %v277_v38 = vadd.f32 %v235_v17, %v169_v20 }
  0xf3   :  { %v273_v10 = vadd.f32 %v227_v21, %v165_v18  ;;  %v172_v21 = vmul.f32 %v2258_v56, %v2130_v26 }
  0xf5   :  { %v296_v30 = vpack.c.bf16 %v273_v10, %v272_v25 }
  0xf7   :  { %1724 = vmatmul.msk.bf16.vlgmr.msra.gmra.mxu1 %vm310_vm0, %v296_v30  ;;  %1732 = vmatmul.msk.bf16.vlgmr.msra.gmra.mxu2 %vm310_vm0, %v296_v30 }
  0xf9   :  { %v233_v6 = vpop.permute.xlu1 %232  ;;  %v237_v35 = vpop.permute.xlu2 %236 }
  0xfa   :  { %v276_v39 = vadd.f32 %v233_v6, %v168_v34  ;;  %v2298_v43 = vpop.permute.xlu0 %158 }
  0xfb   :  { %v167_v46 = vmul.f32 %v2298_v43, %v2077_v14  ;;  %v175_v24 = vmul.f32 %v2298_v43, %v2219_v45  ;;  %v173_v45 = vmul.f32 %v2268_v62, %v2155_v31 }
  0xfc   :  { %v298_v5 = vpack.c.bf16 %v277_v38, %v276_v39 }
  0xfd   :  { %v275_v27 = vadd.f32 %v231_v3, %v167_v46 }
 0x101   :  { %v99_v49 = vpop.permute.xlu1 %98  ;;  %v103_v57 = vpop.permute.xlu2 %102 }
 0x102   :  { %v229_v55 = vpop.permute.xlu0 %228  ;;  %v139_v8 = vsub.f32 %v2114_v23, %v99_v49  ;;  %v170_v23 = vmul.f32 %v2276_v1, %v2160_v32  ;;  %v141_v6 = vsub.f32 %v2181_v37, %v103_v57  ;;  %v176_v37 = vmul.f32 %v2258_v56, %v2244_v51 }
 0x103   :  { %v274_v58 = vadd.f32 %v229_v55, %v166_v54  ;;  %v177_v49 = vmul.f32 %v2268_v62, %v2194_v40 }
 0x104   :  { %v278_v10 = vadd.f32 %v237_v35, %v170_v23 }
 0x105   :  { %v297_v59 = vpack.c.bf16 %v275_v27, %v274_v58 }
 0x107   :  { %1725 = vmatmul.msk.bf16.gmra.mxu1 %vm310_vm0, %v297_v59  ;;  %1733 = vmatmul.msk.bf16.gmra.mxu2 %vm310_vm0, %v297_v59  ;;  %v178_v59 = vmul.f32 %v2276_v1, %v2214_v44 }
 0x109   :  { %v101_v60 = vpop.permute.xlu1 %100  ;;  %v105_v14 = vpop.permute.xlu2 %104 }
 0x10a   :  { %v95_v61 = vpop.permute.xlu0 %94 }
 0x10b   :  { %v137_v63 = vsub.f32 %v2143_v29, %v95_v61  ;;  %v174_v29 = vmul.f32 %v2276_v1, %v2177_v36 }
 0x10d   :  { %v290_v0 = vpack.c.bf16 %v137_v63, %v136_v19 }
 0x10f   :  { %1718 = vmatmul.msk.bf16.gmra.mxu0 %vm310_vm0, %v290_v0  ;;  %1742 = vmatmul.msk.bf16.gmra.mxu3 %vm310_vm0, %v290_v0 }
 0x111   :  { %v243_v9 = vpop.permute.xlu1 %242  ;;  %v247_v12 = vpop.permute.xlu2 %246 }
 0x112   :  { %v97_v7 = vpop.permute.xlu0 %96  ;;  %v283_v11 = vadd.f32 %v247_v12, %v175_v24  ;;  %v281_v30 = vadd.f32 %v243_v9, %v173_v45 }
 0x113   :  { %v138_v13 = vsub.f32 %v2164_v33, %v97_v7  ;;  %v171_v33 = vmul.f32 %v2298_v43, %v2110_v22  ;;  %v140_v22 = vsub.f32 %v2139_v28, %v101_v60 }
 0x115   :  { %v291_v17 = vpack.c.bf16 %v139_v8, %v138_v13  ;;  %v292_v31 = vpack.c.bf16 %v141_v6, %v140_v22 }
 0x117   :  { %1726 = vmatmul.msk.bf16.gmra.mxu1 %vm310_vm0, %v298_v5  ;;  %1734 = vmatmul.msk.bf16.gmra.mxu2 %vm310_vm0, %v298_v5  ;;  %v142_v5 = vsub.f32 %v2202_v42, %v105_v14 }
 0x119   :  { %v245_v15 = vpop.permute.xlu1 %244  ;;  %v249_v28 = vpop.permute.xlu2 %248 }
 0x11a   :  { %v282_v16 = vadd.f32 %v245_v15, %v174_v29  ;;  %v239_v3 = vpop.permute.xlu0 %238  ;;  %v284_v55 = vadd.f32 %v249_v28, %v176_v37 }
 0x11b   :  { %v279_v36 = vadd.f32 %v239_v3, %v171_v33 }
 0x11c   :  { %v301_v18 = vpack.c.bf16 %v283_v11, %v282_v16 }
 0x11d   :  { %v299_v34 = vpack.c.bf16 %v279_v36, %v278_v10 }
 0x11f   :  { %1719 = vmatmul.msk.bf16.gmra.mxu0 %vm310_vm0, %v291_v17  ;;  %1743 = vmatmul.msk.bf16.gmra.mxu3 %vm310_vm0, %v291_v17 }
 0x121   :  { %v111_v39 = vpop.permute.xlu1 %110 }
 0x122   :  { %v241_v25 = vpop.permute.xlu0 %240  ;;  %v145_v62 = vsub.f32 %v2198_v41, %v111_v39 }
 0x123   :  { %v280_v20 = vadd.f32 %v241_v25, %v172_v21 }
 0x125   :  { %v300_v32 = vpack.c.bf16 %v281_v30, %v280_v20 }
 0x127   :  { %1727 = vmatmul.msk.bf16.gmra.mxu1 %vm310_vm0, %v299_v34  ;;  %1735 = vmatmul.msk.bf16.gmra.mxu2 %vm310_vm0, %v299_v34 }
 0x129   :  { %v113_v35 = vpop.permute.xlu1 %112 }
 0x12a   :  { %v107_v38 = vpop.permute.xlu0 %106  ;;  %v146_v44 = vsub.f32 %v2223_v47, %v113_v35 }
 0x12b   :  { %v143_v46 = vsub.f32 %v2227_v48, %v107_v38  ;;  %v179_v48 = vmul.f32 %v2298_v43, %v2239_v50  ;;  %v115_v50 = vpop.permute.xlu2 %114  ;;  %v534_v43 = vpop.f32.mrf.mxu3 }
 0x12c   :  { %v147_v41 = vsub.f32 %v2280_v4, %v115_v50 }
 0x12d   :  { %v293_v57 = vpack.c.bf16 %v143_v46, %v142_v5 }
 0x12e   :  { %v295_v1 = vpack.c.bf16 %v147_v41, %v146_v44 }
 0x12f   :  { %1720 = vmatmul.msk.bf16.gmra.mxu0 %vm310_vm0, %v292_v31  ;;  %1744 = vmatmul.msk.bf16.gmra.mxu3 %vm310_vm0, %v292_v31 }
 0x131   :  { %v255_v42 = vpop.permute.xlu1 %254 }
 0x132   :  { %v109_v26 = vpop.permute.xlu0 %108  ;;  %v287_v56 = vadd.f32 %v255_v42, %v179_v48 }
 0x133   :  { %v144_v60 = vsub.f32 %v2252_v53, %v109_v26  ;;  %v2360_v53 = vpop.f32.mrf.mxu0  ;;  %v2370_v4 = vpop.f32.mrf.mxu3 }
 0x135   :  { %v294_v61 = vpack.c.bf16 %v145_v62, %v144_v60 }
 0x137   :  { %1728 = vmatmul.msk.bf16.gmra.mxu1 %vm310_vm0, %v300_v32  ;;  %1736 = vmatmul.msk.bf16.gmra.mxu2 %vm310_vm0, %v300_v32 }
 0x13a   :  { %v251_v54 = vpop.permute.xlu0 %250 }
 0x13b   :  { %v285_v27 = vadd.f32 %v251_v54, %v177_v49  ;;  %v2364_v63 = vpop.f32.mrf.mxu0 }
 0x13d   :  { %v302_v58 = vpack.c.bf16 %v285_v27, %v284_v55 }
 0x13f   :  { %1721 = vmatmul.msk.bf16.gmra.mxu0 %vm310_vm0, %v293_v57  ;;  %1745 = vmatmul.msk.bf16.gmra.mxu3 %vm310_vm0, %v293_v57 }
 0x142   :  { %v253_v51 = vpop.permute.xlu0 %252 }
 0x143   :  { %v286_v19 = vadd.f32 %v253_v51, %v178_v59 }
 0x145   :  { %v303_v40 = vpack.c.bf16 %v287_v56, %v286_v19 }
 0x147   :  { %1729 = vmatmul.msk.bf16.gmra.mxu1 %vm310_vm0, %v301_v18  ;;  %1737 = vmatmul.msk.bf16.gmra.mxu2 %vm310_vm0, %v301_v18 }
 0x14f   :  { %1722 = vmatmul.msk.bf16.gmra.mxu0 %vm310_vm0, %v294_v61  ;;  %1746 = vmatmul.msk.bf16.gmra.mxu3 %vm310_vm0, %v294_v61 }
 0x157   :  { %1730 = vmatmul.msk.bf16.gmra.mxu1 %vm310_vm0, %v302_v58  ;;  %1738 = vmatmul.msk.bf16.gmra.mxu2 %vm310_vm0, %v302_v58 }
 0x15f   :  { %1723 = vmatmul.msk.bf16.gmra.mxu0 %vm310_vm0, %v295_v1  ;;  %1747 = vmatmul.msk.bf16.gmra.mxu3 %vm310_vm0, %v295_v1 }
 0x163   :  { %v349_v0 = vpop.f32.mrf.mxu0 }
 0x167   :  { %1731 = vmatmul.msk.bf16.gmra.mxu1 %vm310_vm0, %v303_v40  ;;  %1739 = vmatmul.msk.bf16.gmra.mxu2 %vm310_vm0, %v303_v40 }
 0x169   :  { %v539_v12 = vpop.f32.mrf.mxu3 }
 0x16b   :  { %v351_v24 = vpop.f32.mrf.mxu0 }
 0x171   :  { %v541_v15 = vpop.f32.mrf.mxu3 }
 0x174   :  { %v2366_v47 = vpop.f32.mrf.mxu1 }
 0x175   :  { %v460_v14 = vsub.f32 %v2360_v53, %v2366_v47  ;;  %v2416_v47 = vld [vmem:[%s3028_s3] sm:$0xff] }
 0x17a   :  { %v485_v9 = vpop.f32.mrf.mxu2 }
 0x17b   :  { %v2372_v7 = vadd.f32 %v534_v43, %v485_v9 }
 0x17c   :  { %v2374_v8 = vpop.f32.mrf.mxu1 }
 0x182   :  { %v2376_v13 = vpop.f32.mrf.mxu2 }
 0x184   :  { %v425_v29 = vpop.f32.mrf.mxu1 }
 0x185   :  { %v462_v17 = vsub.f32 %v349_v0, %v425_v29 }
 0x18a   :  { %v490_v11 = vpop.f32.mrf.mxu2 }
 0x18b   :  { %v540_v36 = vadd.f32 %v539_v12, %v490_v11 }
 0x18c   :  { %v354_v16 = vpop.f32.mrf.mxu0  ;;  %v427_v3 = vpop.f32.mrf.mxu1 }
 0x18d   :  { %v463_v18 = vsub.f32 %v351_v24, %v427_v3 }
 0x18f   :  { %v1796_v23 = vpack.i.bf16 %v463_v18, %v462_v17 }
 0x191   :  { %1797 = vrot.lane.b32.xlu2 %v1796_v23, %s1956_s22 }
 0x192   :  { %v492_v33 = vpop.f32.mrf.mxu2  ;;  %v544_v45 = vpop.f32.mrf.mxu3 }
 0x193   :  { %v542_v21 = vadd.f32 %v541_v15, %v492_v33 }
 0x194   :  { %v356_v25 = vpop.f32.mrf.mxu0  ;;  %v430_v10 = vpop.f32.mrf.mxu1 }
 0x195   :  { %v1801_v30 = vpack.i.bf16 %v542_v21, %v540_v36  ;;  %v464_v22 = vsub.f32 %v354_v16, %v430_v10 }
 0x197   :  { %1802 = vrot.lane.b32.xlu0 %v1801_v30, %s1956_s22 }
 0x19a   :  { %v495_v20 = vpop.f32.mrf.mxu2  ;;  %v546_v34 = vpop.f32.mrf.mxu3 }
 0x19b   :  { %v545_v35 = vadd.f32 %v544_v45, %v495_v20 }
 0x19c   :  { %v359_v32 = vpop.f32.mrf.mxu0  ;;  %v432_v6 = vpop.f32.mrf.mxu1 }
 0x19d   :  { %v465_v38 = vsub.f32 %v356_v25, %v432_v6 }
 0x19f   :  { %v1806_v31 = vpack.i.bf16 %v465_v38, %v464_v22 }
 0x1a1   :  { %1807 = vrot.lane.b32.xlu1 %v1806_v31, %s1958_s14 }
 0x1a2   :  { %v497_v39 = vpop.f32.mrf.mxu2  ;;  %v549_v26 = vpop.f32.mrf.mxu3 }
 0x1a3   :  { %v547_v5 = vadd.f32 %v546_v34, %v497_v39 }
 0x1a4   :  { %v361_v46 = vpop.f32.mrf.mxu0  ;;  %v435_v28 = vpop.f32.mrf.mxu1 }
 0x1a5   :  { %v1811_v37 = vpack.i.bf16 %v547_v5, %v545_v35  ;;  %v466_v27 = vsub.f32 %v359_v32, %v435_v28 }
 0x1a7   :  { %1812 = vrot.lane.b32.xlu2 %v1811_v37, %s1958_s14 }
 0x1aa   :  { %v500_v49 = vpop.f32.mrf.mxu2  ;;  %v551_v54 = vpop.f32.mrf.mxu3 }
 0x1ab   :  { %v550_v51 = vadd.f32 %v549_v26, %v500_v49 }
 0x1ac   :  { %v364_v55 = vpop.f32.mrf.mxu0  ;;  %v437_v57 = vpop.f32.mrf.mxu1 }
 0x1ad   :  { %v467_v58 = vsub.f32 %v361_v46, %v437_v57 }
 0x1af   :  { %v1816_v42 = vpack.i.bf16 %v467_v58, %v466_v27 }
 0x1b1   :  { %1817 = vrot.lane.b32.xlu0 %v1816_v42, %s1959_s15 }
 0x1b2   :  { %v502_v48 = vpop.f32.mrf.mxu2  ;;  %v554_v59 = vpop.f32.mrf.mxu3 }
 0x1b3   :  { %v552_v56 = vadd.f32 %v551_v54, %v502_v48 }
 0x1b4   :  { %v366_v19 = vpop.f32.mrf.mxu0  ;;  %v440_v40 = vpop.f32.mrf.mxu1 }
 0x1b5   :  { %v1821_v62 = vpack.i.bf16 %v552_v56, %v550_v51  ;;  %v468_v41 = vsub.f32 %v364_v55, %v440_v40 }
 0x1b7   :  { %1822 = vrot.lane.b32.xlu1 %v1821_v62, %s1959_s15 }
 0x1ba   :  { %v505_v60 = vpop.f32.mrf.mxu2  ;;  %v556_v61 = vpop.f32.mrf.mxu3 }
 0x1bb   :  { %v555_v12 = vadd.f32 %v554_v59, %v505_v60 }
 0x1bc   :  { %v369_v50 = vpop.f32.mrf.mxu0  ;;  %v442_v44 = vpop.f32.mrf.mxu1 }
 0x1bd   :  { %v469_v1 = vsub.f32 %v366_v19, %v442_v44 }
 0x1bf   :  { %v1826_v43 = vpack.i.bf16 %v469_v1, %v468_v41 }
 0x1c1   :  { %1827 = vrot.lane.b32.xlu2 %v1826_v43, %s1960_s16 }
 0x1c2   :  { %v507_v0 = vpop.f32.mrf.mxu2  ;;  %v559_v9 = vpop.f32.mrf.mxu3 }
 0x1c3   :  { %v557_v24 = vadd.f32 %v556_v61, %v507_v0 }
 0x1c4   :  { %v371_v29 = vpop.f32.mrf.mxu0  ;;  %v445_v15 = vpop.f32.mrf.mxu1 }
 0x1c5   :  { %v1831_v11 = vpack.i.bf16 %v557_v24, %v555_v12  ;;  %v470_v18 = vsub.f32 %v369_v50, %v445_v15  ;;  %v461_v15 = vsub.f32 %v2364_v63, %v2374_v8 }
 0x1c7   :  { %1832 = vrot.lane.b32.xlu0 %v1831_v11, %s1960_s16 }
 0x1ca   :  { %v510_v16 = vpop.f32.mrf.mxu2  ;;  %v561_v3 = vpop.f32.mrf.mxu3 }
 0x1cb   :  { %v560_v21 = vadd.f32 %v559_v9, %v510_v16 }
 0x1cc   :  { %v447_v17 = vpop.f32.mrf.mxu1  ;;  %v374_v33 = vpop.f32.mrf.mxu0 }
 0x1cd   :  { %v471_v23 = vsub.f32 %v371_v29, %v447_v17 }
 0x1cf   :  { %v1836_v45 = vpack.i.bf16 %v471_v23, %v470_v18 }
 0x1d1   :  { %1837 = vrot.lane.b32.xlu1 %v1836_v45, %s1961_s17 }
 0x1d2   :  { %v512_v36 = vpop.f32.mrf.mxu2  ;;  %v564_v10 = vpop.f32.mrf.mxu3 }
 0x1d3   :  { %v562_v25 = vadd.f32 %v561_v3, %v512_v36 }
 0x1d4   :  { %v450_v30 = vpop.f32.mrf.mxu1  ;;  %v376_v34 = vpop.f32.mrf.mxu0 }
 0x1d5   :  { %v1841_v20 = vpack.i.bf16 %v562_v25, %v560_v21  ;;  %v472_v22 = vsub.f32 %v374_v33, %v450_v30 }
 0x1d7   :  { %1842 = vrot.lane.b32.xlu2 %v1841_v20, %s1961_s17 }
 0x1da   :  { %v515_v32 = vpop.f32.mrf.mxu2  ;;  %v566_v31 = vpop.f32.mrf.mxu3 }
 0x1db   :  { %v565_v5 = vadd.f32 %v564_v10, %v515_v32  ;;  %v2426_v10 = vld [vmem:[%s3028_s3 + $0x8] sm:$0xff]  ;;  %v45_v32 = vld [vmem:[%s3026_s4] sm:$0xff]  }
 0x1dc   :  { %v452_v6 = vpop.f32.mrf.mxu1  ;;  %v379_v26 = vpop.f32.mrf.mxu0 }
 0x1dd   :  { %v473_v38 = vsub.f32 %v376_v34, %v452_v6 }
 0x1df   :  { %v1846_v39 = vpack.i.bf16 %v473_v38, %v472_v22 }
 0x1e1   :  { %1847 = vrot.lane.b32.xlu0 %v1846_v39, %s1962_s18 }
 0x1e2   :  { %v517_v35 = vpop.f32.mrf.mxu2  ;;  %v569_v49 = vpop.f32.mrf.mxu3 }
 0x1e3   :  { %v567_v46 = vadd.f32 %v566_v31, %v517_v35 }
 0x1e4   :  { %v455_v28 = vpop.f32.mrf.mxu1  ;;  %v381_v55 = vpop.f32.mrf.mxu0 }
 0x1e5   :  { %v1851_v37 = vpack.i.bf16 %v567_v46, %v565_v5  ;;  %v474_v27 = vsub.f32 %v379_v26, %v455_v28  ;;  %v47_v46 = vunpack.c.l.bf16 %v45_v32  ;;  %v48_v28 = vunpack.c.h.bf16 %v45_v32 }
 0x1e7   :  { %1852 = vrot.lane.b32.xlu1 %v1851_v37, %s1962_s18 }
 0x1ea   :  { %v520_v54 = vpop.f32.mrf.mxu2  ;;  %v571_v48 = vpop.f32.mrf.mxu3 }
 0x1eb   :  { %v570_v51 = vadd.f32 %v569_v49, %v520_v54  ;;  %v1798_v40 = vpop.permute.xlu2 %1797  ;;  %v49_v49 = vsub.f32 0.0, %v47_v46  ;;  %v50_v54 = vsub.f32 0.0, %v48_v28 }
 0x1ec   :  { %v457_v57 = vpop.f32.mrf.mxu1  ;;  %v1799_v1 = vunpack.i.l.bf16 %v1798_v40  ;;  %v1800_v0 = vunpack.i.h.bf16 %v1798_v40 }
 0x1ed   :  { %v475_v58 = vsub.f32 %v381_v55, %v457_v57 }
 0x1ee   :  { %v630_v16 = vsel %vm310_vm0, %v460_v14, %v1799_v1  ;;  %v631_v17 = vsel %vm310_vm0, %v461_v15, %v1800_v0 }
 0x1ef   :  { %v1856_v42 = vpack.i.bf16 %v475_v58, %v474_v27  ;;  %788 = vrot.lane.b32.xlu1 %v2416_v47, %s1958_s14  ;;  %v51_v27 = vpack.c.bf16 %v50_v54, %v49_v49  ;;  %v537_v58 = vadd.f32 %v2370_v4, %v2376_v13 }
 0x1f1   :  { %1857 = vrot.lane.b32.xlu2 %v1856_v42, %s1957_s23 }
 0x1f2   :  { %v522_v59 = vpop.f32.mrf.mxu2 }
 0x1f3   :  { %v572_v56 = vadd.f32 %v571_v48, %v522_v59 }
 0x1f5   :  { %v1861_v19 = vpack.i.bf16 %v572_v56, %v570_v51 }
 0x1f7   :  { %1862 = vrot.lane.b32.xlu0 %v1861_v19, %s1957_s23  ;;  %796 = vrot.lane.b32.xlu1 %v2426_v10, %s1960_s16 }
 0x1f9   :  { %790 = vrot.lane.b32.xlu2 %v2426_v10, %s1958_s14 }
 0x1ff   :  { %794 = vrot.lane.b32.xlu0 %v2416_v47, %s1960_s16  ;;  %833 = vrot.lane.b32.xlu1 %v51_v27, %s1957_s23 }
 0x201   :  { %v2392_v62 = vpop.permute.xlu2 %1812  ;;  %800 = vrot.lane.b32.xlu2 %v2416_v47, %s1962_s18 }
 0x202   :  { %v1815_v56 = vunpack.i.h.bf16 %v2392_v62  ;;  %v1814_v19 = vunpack.i.l.bf16 %v2392_v62 }
 0x207   :  { %802 = vrot.lane.b32.xlu0 %v2426_v10, %s1962_s18 }
 0x209   :  { %v2394_v60 = vpop.permute.xlu0 %1802 }
 0x20a   :  { %v1805_v55 = vunpack.i.h.bf16 %v2394_v60  ;;  %v1804_v57 = vunpack.i.l.bf16 %v2394_v60 }
 0x20c   :  { %v707_v42 = vsel %vm310_vm0, %v537_v58, %v1805_v55  ;;  %v706_v48 = vsel %vm310_vm0, %v2372_v7, %v1804_v57 }
 0x20d   :  { %v708_v13 = vsel %vm632_vm2, %v706_v48, %v1814_v19 }
 0x213   :  { %v1808_v61 = vpop.permute.xlu1 %1807 }
 0x214   :  { %v1809_v9 = vunpack.i.l.bf16 %v1808_v61  ;;  %v1810_v24 = vunpack.i.h.bf16 %v1808_v61  ;;  %v709_v61 = vsel %vm632_vm2, %v707_v42, %v1815_v56 }
 0x216   :  { %v633_v18 = vsel %vm632_vm2, %v630_v16, %v1809_v9  ;;  %v634_v23 = vsel %vm632_vm2, %v631_v17, %v1810_v24 }
 0x21b   :  { %v1828_v50 = vpop.permute.xlu2 %1827 }
 0x21c   :  { %v1829_v45 = vunpack.i.l.bf16 %v1828_v50  ;;  %v1830_v21 = vunpack.i.h.bf16 %v1828_v50 }
 0x223   :  { %v1818_v44 = vpop.permute.xlu0 %1817 }
 0x224   :  { %v1819_v29 = vunpack.i.l.bf16 %v1818_v44  ;;  %v1820_v11 = vunpack.i.h.bf16 %v1818_v44 }
 0x226   :  { %v636_v33 = vsel %vm635_vm1, %v633_v18, %v1819_v29  ;;  %v637_v63 = vsel %vm635_vm1, %v634_v23, %v1820_v11 }
 0x227   :  { %v639_v14 = vsel %vm638_vm3, %v636_v33, %v1829_v45  ;;  %v640_v30 = vsel %vm638_vm3, %v637_v63, %v1830_v21 }
 0x229   :  { %v2396_v41 = vpop.permute.xlu1 %1822 }
 0x22a   :  { %v1825_v59 = vunpack.i.h.bf16 %v2396_v41  ;;  %v1824_v51 = vunpack.i.l.bf16 %v2396_v41 }
 0x22c   :  { %v710_v7 = vsel %vm635_vm1, %v708_v13, %v1824_v51  ;;  %v711_v50 = vsel %vm635_vm1, %v709_v61, %v1825_v59 }
 0x231   :  { %v2398_v43 = vpop.permute.xlu2 %1842 }
 0x232   :  { %v1845_v0 = vunpack.i.h.bf16 %v2398_v43  ;;  %v1844_v9 = vunpack.i.l.bf16 %v2398_v43 }
 0x239   :  { %v2400_v12 = vpop.permute.xlu0 %1832 }
 0x23a   :  { %v1835_v40 = vunpack.i.h.bf16 %v2400_v12  ;;  %v1834_v60 = vunpack.i.l.bf16 %v2400_v12 }
 0x23c   :  { %v712_v44 = vsel %vm638_vm3, %v710_v7, %v1834_v60  ;;  %v713_v41 = vsel %vm638_vm3, %v711_v50, %v1835_v40 }
 0x23d   :  { %v714_v15 = vsel %vm641_vm4, %v712_v44, %v1844_v9  ;;  %v715_v11 = vsel %vm641_vm4, %v713_v41, %v1845_v0  ;;  %v1936_v0 = vld [vmem:[%s3025_s1] sm:$0xff] }
 0x243   :  { %v1838_v3 = vpop.permute.xlu1 %1837 }
 0x244   :  { %v1840_v8 = vunpack.i.h.bf16 %v1838_v3  ;;  %v1839_v36 = vunpack.i.l.bf16 %v1838_v3 }
 0x246   :  { %v642_v6 = vsel %vm641_vm4, %v639_v14, %v1839_v36  ;;  %v643_v22 = vsel %vm641_vm4, %v640_v30, %v1840_v8 }
 0x24b   :  { %v1858_v53 = vpop.permute.xlu2 %1857 }
 0x24c   :  { %v1860_v38 = vunpack.i.h.bf16 %v1858_v53  ;;  %v1859_v31 = vunpack.i.l.bf16 %v1858_v53 }
 0x253   :  { %v1848_v25 = vpop.permute.xlu0 %1847  ;;  %v791_v33 = vpop.permute.xlu2 %790 }
 0x254   :  { %v1850_v20 = vunpack.i.h.bf16 %v1848_v25  ;;  %v1849_v34 = vunpack.i.l.bf16 %v1848_v25  ;;  %v807_v36 = vsel %vm632_vm2, %v2426_v10, %v791_v33 }
 0x256   :  { %v645_v39 = vsel %vm644_vm5, %v642_v6, %v1849_v34  ;;  %v646_v26 = vsel %vm644_vm5, %v643_v22, %v1850_v20 }
 0x257   :  { %v648_v35 = vsel %vm647_vm6, %v645_v39, %v1859_v31  ;;  %v649_v5 = vsel %vm647_vm6, %v646_v26, %v1860_v38 }
 0x258   :  { %v720_v37 = vpack.c.bf16 %v649_v5, %v648_v35 }
 0x259   :  { %v1853_v4 = vpop.permute.xlu1 %1852 }
 0x25a   :  { %732 = vmatpush.bf16.msrb.mxu0 %v720_v37  ;;  %765 = vmatpush.bf16.msrb.mxu2 %v720_v37  ;;  %v1855_v62 = vunpack.i.h.bf16 %v1853_v4  ;;  %v1854_v1 = vunpack.i.l.bf16 %v1853_v4 }
 0x25b   :  { %v801_v30 = vpop.permute.xlu2 %800 }
 0x25c   :  { %v716_v16 = vsel %vm644_vm5, %v714_v15, %v1854_v1  ;;  %v717_v3 = vsel %vm644_vm5, %v715_v11, %v1855_v62  ;;  %v2521_v1 = vstv %s3029_s0 }
 0x25d   :  { %1750 = vmatmul.msk.bf16.vlgmr.msrb.gmra.mxu2 %vm310_vm0, %v2246_v52  ;;  %1748 = vmatmul.msk.bf16.vlgmr.msrb.gmra.mxu0 %vm310_vm0, %v2012_v2  ;;  %v2527_v9 = vmul.f32 %v1936_v0, %v2521_v1 }
 0x261   :  { %v789_v43 = vpop.permute.xlu1 %788 }
 0x262   :  { %v806_v21 = vsel %vm632_vm2, %v2416_v47, %v789_v43 }
 0x269   :  { %v1863_v12 = vpop.permute.xlu0 %1862  ;;  %v797_v53 = vpop.permute.xlu1 %796 }
 0x26a   :  { %v1865_v24 = vunpack.i.h.bf16 %v1863_v12  ;;  %v1864_v29 = vunpack.i.l.bf16 %v1863_v12 }
 0x26c   :  { %v718_v17 = vsel %vm647_vm6, %v716_v16, %v1864_v29  ;;  %v719_v18 = vsel %vm647_vm6, %v717_v3, %v1865_v24 }
 0x26d   :  { %v721_v23 = vpack.c.bf16 %v719_v18, %v718_v17 }
 0x26f   :  { %749 = vmatpush.bf16.msrb.mxu1 %v721_v23  ;;  %779 = vmatpush.bf16.msrb.mxu3 %v721_v23 }
 0x271   :  { %v795_v45 = vpop.permute.xlu0 %794  ;;  %v834_v37 = vpop.permute.xlu1 %833 }
 0x272   :  { %1749 = vmatmul.msk.bf16.vlgmr.msrb.gmra.mxu1 %vm310_vm0, %v2246_v52  ;;  %1751 = vmatmul.msk.bf16.vlgmr.msrb.gmra.mxu3 %vm310_vm0, %v2012_v2  ;;  %v808_v25 = vsel %vm638_vm3, %v806_v21, %v795_v45  ;;  %v809_v52 = vsel %vm638_vm3, %v807_v36, %v797_v53 }
 0x273   :  { %v810_v6 = vsel %vm644_vm5, %v808_v25, %v801_v30 }
 0x279   :  { %v803_v20 = vpop.permute.xlu0 %802 }
 0x27a   :  { %v811_v31 = vsel %vm644_vm5, %v809_v52, %v803_v20 }
 0x2da   :  { %v734_v63 = vpop.f32.mrf.mxu0 }
 0x2e0   :  { %v767_v14 = vpop.f32.mrf.mxu2 }
 0x2e2   :  { %v736_v22 = vpop.f32.mrf.mxu0 }
 0x2e8   :  { %v769_v5 = vpop.f32.mrf.mxu2 }
 0x2ef   :  { %v751_v8 = vpop.f32.mrf.mxu1 }
 0x2f0   :  { %v756_v32 = vsub.f32 %v734_v63, %v751_v8 }
 0x2f2   :  { %v812_v39 = vmul.f32 %v810_v6, %v756_v32 }
 0x2f5   :  { %v781_v34 = vpop.f32.mrf.mxu3 }
 0x2f6   :  { %v782_v47 = vadd.f32 %v781_v34, %v767_v14 }
 0x2f7   :  { %v753_v38 = vpop.f32.mrf.mxu1 }
 0x2f8   :  { %v757_v10 = vsub.f32 %v736_v22, %v753_v38  ;;  %v814_v49 = vmul.f32 %v810_v6, %v782_v47 }
 0x2fa   :  { %v813_v26 = vmul.f32 %v811_v31, %v757_v10 }
 0x2fc   :  { %v816_v35 = vpack.c.bf16 %v813_v26, %v812_v39 }
 0x2fd   :  { %v783_v46 = vpop.f32.mrf.mxu3 }
 0x2fe   :  { %v784_v28 = vadd.f32 %v783_v46, %v769_v5  ;;  %825 = vmatpush.bf16.msra.mxu0 %v816_v35  ;;  %861 = vmatpush.bf16.msra.mxu2 %v816_v35 }
 0x300   :  { %v815_v54 = vmul.f32 %v811_v31, %v784_v28 }
 0x301   :  { %1754 = vmatmul.msk.bf16.vlgmr.msra.gmra.mxu2 %vm310_vm0, %v834_v37  ;;  %1752 = vmatmul.msk.bf16.vlgmr.msra.gmra.mxu0 %vm310_vm0, %v2012_v2 }
 0x302   :  { %1017 = vmatpush.bf16.msrb.mxu0 %v2012_v2  ;;  %1156 = vmatpush.bf16.msrb.mxu2 %v2012_v2  ;;  %v817_v55 = vpack.c.bf16 %v815_v54, %v814_v49 }
 0x304   :  { %845 = vmatpush.bf16.msra.mxu1 %v817_v55  ;;  %875 = vmatpush.bf16.msra.mxu3 %v817_v55 }
 0x307   :  { %1755 = vmatmul.msk.bf16.vlgmr.msra.gmra.mxu3 %vm310_vm0, %v2012_v2  ;;  %1753 = vmatmul.msk.bf16.vlgmr.msra.gmra.mxu1 %vm310_vm0, %v834_v37 }
 0x308   :  { %1091 = vmatpush.bf16.msrb.mxu1 %v834_v37  ;;  %1205 = vmatpush.bf16.msrb.mxu3 %v834_v37 }
 0x37e   :  { %v827_v57 = vpop.f32.mrf.mxu0 }
 0x384   :  { %v847_v27 = vpop.f32.mrf.mxu1  ;;  %v863_v58 = vpop.f32.mrf.mxu2 }
 0x385   :  { %v852_v51 = vsub.f32 %v827_v57, %v847_v27 }
 0x386   :  { %v829_v48 = vpop.f32.mrf.mxu0 }
 0x38a   :  { %v877_v42 = vpop.f32.mrf.mxu3 }
 0x38b   :  { %v878_v2 = vadd.f32 %v877_v42, %v863_v58 }
 0x38c   :  { %v849_v59 = vpop.f32.mrf.mxu1  ;;  %v865_v60 = vpop.f32.mrf.mxu2 }
 0x38d   :  { %v853_v56 = vsub.f32 %v829_v48, %v849_v59 }
 0x38f   :  { %v1876_v19 = vpack.i.bf16 %v853_v56, %v852_v51  ;;  %v970_v40 = vpack.c.bf16 %v853_v56, %v852_v51 }
 0x391   :  { %1877 = vrot.lane.b32.xlu1 %v1876_v19, %s1962_s18  ;;  %1756 = vmatmul.msk.bf16.vlgmr.msrb.gmra.mxu0 %vm310_vm0, %v970_v40 }
 0x392   :  { %v879_v4 = vpop.f32.mrf.mxu3  ;;  %1780 = vmatmul.msk.bf16.vlgmr.msrb.gmra.mxu3 %vm310_vm0, %v970_v40  ;;  %1867 = vrot.lane.b32.xlu2 %v1876_v19, %s1957_s23 }
 0x393   :  { %v880_v13 = vadd.f32 %v879_v4, %v865_v60 }
 0x395   :  { %v1871_v61 = vpack.i.bf16 %v880_v13, %v878_v2  ;;  %v978_v7 = vpack.c.bf16 %v880_v13, %v878_v2 }
 0x397   :  { %1872 = vrot.lane.b32.xlu0 %v1871_v61, %s1957_s23  ;;  %1764 = vmatmul.msk.bf16.vlgmr.msrb.gmra.mxu1 %vm310_vm0, %v978_v7 }
 0x398   :  { %1772 = vmatmul.msk.bf16.vlgmr.msrb.gmra.mxu2 %vm310_vm0, %v978_v7 }
 0x399   :  { %1892 = vrot.lane.b32.xlu1 %v1871_v61, %s1961_s17 }
 0x39a   :  { %1882 = vrot.lane.b32.xlu2 %v1871_v61, %s1962_s18 }
 0x39f   :  { %1887 = vrot.lane.b32.xlu0 %v1876_v19, %s1961_s17 }
 0x3a1   :  { %1907 = vrot.lane.b32.xlu1 %v1876_v19, %s1959_s15 }
 0x3a2   :  { %1897 = vrot.lane.b32.xlu2 %v1876_v19, %s1960_s16 }
 0x3a7   :  { %1902 = vrot.lane.b32.xlu0 %v1871_v61, %s1960_s16 }
 0x3a9   :  { %1922 = vrot.lane.b32.xlu1 %v1871_v61, %s1958_s14 }
 0x3aa   :  { %1912 = vrot.lane.b32.xlu2 %v1871_v61, %s1959_s15 }
 0x3af   :  { %1917 = vrot.lane.b32.xlu0 %v1876_v19, %s1958_s14 }
 0x3b2   :  { %1927 = vrot.lane.b32.xlu2 %v1876_v19, %s1956_s22 }
 0x3b7   :  { %1932 = vrot.lane.b32.xlu0 %v1871_v61, %s1956_s22 }
 0x3ba   :  { %1668 = vrot.lane.b32.xlu2 %v2527_v9, %s1957_s23 }
 0x3ec   :  { %v1868_v50 = vpop.permute.xlu2 %1867 }
 0x3ed   :  { %v1870_v44 = vunpack.i.h.bf16 %v1868_v50  ;;  %v1869_v41 = vunpack.i.l.bf16 %v1868_v50 }
 0x3ef   :  { %v971_v62 = vpack.c.bf16 %v1870_v44, %v1869_v41 }
 0x3f1   :  { %1757 = vmatmul.msk.bf16.gmra.mxu0 %vm310_vm0, %v971_v62  ;;  %1781 = vmatmul.msk.bf16.gmra.mxu3 %vm310_vm0, %v971_v62 }
 0x3f4   :  { %v1883_v8 = vpop.permute.xlu2 %1882 }
 0x3f5   :  { %v1885_v21 = vunpack.i.h.bf16 %v1883_v8  ;;  %v1884_v53 = vunpack.i.l.bf16 %v1883_v8 }
 0x3f7   :  { %v980_v30 = vpack.c.bf16 %v1885_v21, %v1884_v53 }
 0x3fc   :  { %v1898_v20 = vpop.permute.xlu2 %1897 }
 0x3fd   :  { %v1900_v32 = vunpack.i.h.bf16 %v1898_v20  ;;  %v1899_v6 = vunpack.i.l.bf16 %v1898_v20 }
 0x3ff   :  { %v974_v47 = vpack.c.bf16 %v1900_v32, %v1899_v6 }
 0x403   :  { %v1878_v12 = vpop.permute.xlu1 %1877 }
 0x404   :  { %v1880_v24 = vunpack.i.h.bf16 %v1878_v12  ;;  %v1879_v29 = vunpack.i.l.bf16 %v1878_v12  ;;  %v1913_v51 = vpop.permute.xlu2 %1912 }
 0x405   :  { %v1915_v19 = vunpack.i.h.bf16 %v1913_v51  ;;  %v1914_v40 = vunpack.i.l.bf16 %v1913_v51 }
 0x406   :  { %v972_v15 = vpack.c.bf16 %v1880_v24, %v1879_v29 }
 0x407   :  { %v983_v60 = vpack.c.bf16 %v1915_v19, %v1914_v40 }
 0x408   :  { %1758 = vmatmul.msk.bf16.gmra.mxu0 %vm310_vm0, %v972_v15  ;;  %1782 = vmatmul.msk.bf16.gmra.mxu3 %vm310_vm0, %v972_v15 }
 0x409   :  { %v1873_v11 = vpop.permute.xlu0 %1872 }
 0x40a   :  { %v1875_v16 = vunpack.i.h.bf16 %v1873_v11  ;;  %v1874_v3 = vunpack.i.l.bf16 %v1873_v11 }
 0x40b   :  { %v1893_v26 = vpop.permute.xlu1 %1892 }
 0x40c   :  { %v979_v17 = vpack.c.bf16 %v1875_v16, %v1874_v3  ;;  %v1895_v35 = vunpack.i.h.bf16 %v1893_v26  ;;  %v1894_v5 = vunpack.i.l.bf16 %v1893_v26  ;;  %v1928_v4 = vpop.permute.xlu2 %1927 }
 0x40d   :  { %v1930_v2 = vunpack.i.h.bf16 %v1928_v4  ;;  %v1929_v13 = vunpack.i.l.bf16 %v1928_v4 }
 0x40e   :  { %1765 = vmatmul.msk.bf16.gmra.mxu1 %vm310_vm0, %v979_v17  ;;  %1773 = vmatmul.msk.bf16.gmra.mxu2 %vm310_vm0, %v979_v17  ;;  %v1019_v33 = vpop.f32.mrf.mxu0  ;;  %v981_v46 = vpack.c.bf16 %v1895_v35, %v1894_v5  ;;  %v2576_v17 = vld [vmem:[%s3027_s2] sm:$0xff] }
 0x40f   :  { %v977_v7 = vpack.c.bf16 %v1930_v2, %v1929_v13 }
 0x411   :  { %v1888_v18 = vpop.permute.xlu0 %1887 }
 0x412   :  { %v1890_v23 = vunpack.i.h.bf16 %v1888_v18  ;;  %v1889_v43 = vunpack.i.l.bf16 %v1888_v18 }
 0x413   :  { %v1908_v28 = vpop.permute.xlu1 %1907 }
 0x414   :  { %v1093_v45 = vpop.f32.mrf.mxu1  ;;  %v973_v36 = vpack.c.bf16 %v1890_v23, %v1889_v43  ;;  %v1910_v37 = vunpack.i.h.bf16 %v1908_v28  ;;  %v1909_v49 = vunpack.i.l.bf16 %v1908_v28  ;;  %v2589_v20 = vpop.permute.xlu2 %1668 }
 0x415   :  { %v2535_v63 = vsub.f32 %v1019_v33, %v1093_v45  ;;  %v1207_v14 = vpop.f32.mrf.mxu3 }
 0x416   :  { %v1021_v31 = vpop.f32.mrf.mxu0  ;;  %v975_v55 = vpack.c.bf16 %v1910_v37, %v1909_v49 }
 0x417   :  { %1483 = vrot.lane.b32.xlu0 %v2535_v63, %s1956_s22 }
 0x418   :  { %1759 = vmatmul.msk.bf16.gmra.mxu0 %vm310_vm0, %v973_v36  ;;  %1783 = vmatmul.msk.bf16.gmra.mxu3 %vm310_vm0, %v973_v36 }
 0x419   :  { %v1903_v54 = vpop.permute.xlu0 %1902 }
 0x41a   :  { %v1905_v57 = vunpack.i.h.bf16 %v1903_v54  ;;  %v1904_v27 = vunpack.i.l.bf16 %v1903_v54 }
 0x41b   :  { %v1158_v25 = vpop.f32.mrf.mxu2  ;;  %v1923_v61 = vpop.permute.xlu1 %1922 }
 0x41c   :  { %v2541_v52 = vadd.f32 %v1207_v14, %v1158_v25  ;;  %v1095_v34 = vpop.f32.mrf.mxu1  ;;  %v982_v58 = vpack.c.bf16 %v1905_v57, %v1904_v27  ;;  %v1925_v50 = vunpack.i.h.bf16 %v1923_v61  ;;  %v1924_v44 = vunpack.i.l.bf16 %v1923_v61 }
 0x41d   :  { %v1209_v38 = vpop.f32.mrf.mxu3  ;;  %v2549_v39 = vsub.f32 %v1021_v31, %v1095_v34  ;;  %v2599_v31 = vld [vmem:[%s3027_s2 + $0x8] sm:$0xff] }
 0x41e   :  { %1766 = vmatmul.msk.bf16.gmra.mxu1 %vm310_vm0, %v980_v30  ;;  %1774 = vmatmul.msk.bf16.gmra.mxu2 %vm310_vm0, %v980_v30  ;;  %v984_v41 = vpack.c.bf16 %v1925_v50, %v1924_v44 }
 0x41f   :  { %1279 = vrot.lane.b32.xlu1 %v2541_v52, %s1956_s22 }
 0x421   :  { %v1918_v42 = vpop.permute.xlu0 %1917 }
 0x422   :  { %v1920_v48 = vunpack.i.h.bf16 %v1918_v42  ;;  %v1919_v59 = vunpack.i.l.bf16 %v1918_v42 }
 0x423   :  { %v1160_v22 = vpop.f32.mrf.mxu2 }
 0x424   :  { %v2547_v10 = vadd.f32 %v1209_v38, %v1160_v22  ;;  %v976_v56 = vpack.c.bf16 %v1920_v48, %v1919_v59 }
 0x426   :  { %1281 = vrot.lane.b32.xlu2 %v2547_v10, %s1956_s22 }
 0x427   :  { %1485 = vrot.lane.b32.xlu1 %v2549_v39, %s1956_s22 }
 0x428   :  { %1760 = vmatmul.msk.bf16.gmra.mxu0 %vm310_vm0, %v974_v47  ;;  %1784 = vmatmul.msk.bf16.gmra.mxu3 %vm310_vm0, %v974_v47 }
 0x429   :  { %v1933_v62 = vpop.permute.xlu0 %1932 }
 0x42a   :  { %v1935_v0 = vunpack.i.h.bf16 %v1933_v62  ;;  %v1934_v12 = vunpack.i.l.bf16 %v1933_v62 }
 0x42c   :  { %v985_v24 = vpack.c.bf16 %v1935_v0, %v1934_v12 }
 0x42e   :  { %1767 = vmatmul.msk.bf16.gmra.mxu1 %vm310_vm0, %v981_v46  ;;  %1775 = vmatmul.msk.bf16.gmra.mxu2 %vm310_vm0, %v981_v46 }
 0x438   :  { %1761 = vmatmul.msk.bf16.gmra.mxu0 %vm310_vm0, %v975_v55  ;;  %1785 = vmatmul.msk.bf16.gmra.mxu3 %vm310_vm0, %v975_v55 }
 0x43e   :  { %1768 = vmatmul.msk.bf16.gmra.mxu1 %vm310_vm0, %v982_v58  ;;  %1776 = vmatmul.msk.bf16.gmra.mxu2 %vm310_vm0, %v982_v58 }
 0x448   :  { %1762 = vmatmul.msk.bf16.gmra.mxu0 %vm310_vm0, %v976_v56  ;;  %1786 = vmatmul.msk.bf16.gmra.mxu3 %vm310_vm0, %v976_v56 }
 0x44e   :  { %1769 = vmatmul.msk.bf16.gmra.mxu1 %vm310_vm0, %v983_v60  ;;  %1777 = vmatmul.msk.bf16.gmra.mxu2 %vm310_vm0, %v983_v60 }
 0x458   :  { %1763 = vmatmul.msk.bf16.gmra.mxu0 %vm310_vm0, %v977_v7  ;;  %1787 = vmatmul.msk.bf16.gmra.mxu3 %vm310_vm0, %v977_v7 }
 0x45e   :  { %1770 = vmatmul.msk.bf16.gmra.mxu1 %vm310_vm0, %v984_v41  ;;  %1778 = vmatmul.msk.bf16.gmra.mxu2 %vm310_vm0, %v984_v41 }
 0x46e   :  { %1771 = vmatmul.msk.bf16.gmra.mxu1 %vm310_vm0, %v985_v24  ;;  %1779 = vmatmul.msk.bf16.gmra.mxu2 %vm310_vm0, %v985_v24  ;;  %v1024_v29 = vpop.f32.mrf.mxu0 }
 0x474   :  { %v1212_v15 = vpop.f32.mrf.mxu3 }
 0x476   :  { %v1026_v11 = vpop.f32.mrf.mxu0 }
 0x47c   :  { %v1214_v16 = vpop.f32.mrf.mxu3 }
 0x480   :  { %v1282_v5 = vpop.permute.xlu2 %1281 }
 0x481   :  { %v1328_v37 = vmul.f32 %v2599_v31, %v1282_v5 }
 0x485   :  { %v1029_v23 = vpop.f32.mrf.mxu0 }
 0x489   :  { %v1484_v3 = vpop.permute.xlu0 %1483 }
 0x48a   :  { %v1531_v18 = vmul.f32 %v2576_v17, %v1484_v3 }
 0x48b   :  { %v1098_v43 = vpop.f32.mrf.mxu1  ;;  %v1217_v33 = vpop.f32.mrf.mxu3 }
 0x48c   :  { %v2579_v45 = vsub.f32 %v1024_v29, %v1098_v43  ;;  %1563 = vrot.lane.b32.xlu1 %v1531_v18, %s1957_s23 }
 0x48d   :  { %v1031_v14 = vpop.f32.mrf.mxu0 }
 0x48e   :  { %1487 = vrot.lane.b32.xlu2 %v2579_v45, %s1956_s22 }
 0x491   :  { %v1163_v8 = vpop.f32.mrf.mxu2  ;;  %v1280_v36 = vpop.permute.xlu1 %1279 }
 0x492   :  { %v2584_v21 = vadd.f32 %v1212_v15, %v1163_v8  ;;  %v1327_v25 = vmul.f32 %v2576_v17, %v1280_v36 }
 0x493   :  { %v1100_v53 = vpop.f32.mrf.mxu1  ;;  %v1219_v30 = vpop.f32.mrf.mxu3 }
 0x494   :  { %1283 = vrot.lane.b32.xlu0 %v2584_v21, %s1956_s22  ;;  %v2592_v6 = vsub.f32 %v1026_v11, %v1100_v53 }
 0x495   :  { %v1034_v47 = vpop.f32.mrf.mxu0 }
 0x496   :  { %1359 = vrot.lane.b32.xlu2 %v1327_v25, %s1957_s23 }
 0x499   :  { %v1165_v34 = vpop.f32.mrf.mxu2  ;;  %v1486_v32 = vpop.permute.xlu1 %1485 }
 0x49a   :  { %v2594_v22 = vadd.f32 %v1214_v16, %v1165_v34  ;;  %v1532_v26 = vmul.f32 %v2599_v31, %v1486_v32 }
 0x49b   :  { %v1103_v38 = vpop.f32.mrf.mxu1  ;;  %v1222_v35 = vpop.f32.mrf.mxu3 }
 0x49c   :  { %1285 = vrot.lane.b32.xlu1 %v2594_v22, %s1956_s22  ;;  %1489 = vrot.lane.b32.xlu0 %v2592_v6, %s1956_s22  ;;  %v2607_v28 = vsub.f32 %v1029_v23, %v1103_v38 }
 0x49d   :  { %v1036_v55 = vpop.f32.mrf.mxu0 }
 0x49e   :  { %1565 = vrot.lane.b32.xlu2 %v1532_v26, %s1957_s23 }
 0x4a1   :  { %v1168_v46 = vpop.f32.mrf.mxu2 }
 0x4a2   :  { %v2610_v54 = vadd.f32 %v1217_v33, %v1168_v46 }
 0x4a3   :  { %v1105_v49 = vpop.f32.mrf.mxu1  ;;  %v1224_v57 = vpop.f32.mrf.mxu3 }
 0x4a4   :  { %1491 = vrot.lane.b32.xlu1 %v2607_v28, %s1956_s22  ;;  %1361 = vrot.lane.b32.xlu0 %v1328_v37, %s1957_s23  ;;  %v2619_v48 = vsub.f32 %v1031_v14, %v1105_v49 }
 0x4a5   :  { %v1039_v51 = vpop.f32.mrf.mxu0 }
 0x4a6   :  { %1287 = vrot.lane.b32.xlu2 %v2610_v54, %s1956_s22 }
 0x4a9   :  { %v1170_v27 = vpop.f32.mrf.mxu2 }
 0x4aa   :  { %v2617_v58 = vadd.f32 %v1219_v30, %v1170_v27 }
 0x4ab   :  { %v1108_v42 = vpop.f32.mrf.mxu1  ;;  %v1227_v40 = vpop.f32.mrf.mxu3 }
 0x4ac   :  { %1289 = vrot.lane.b32.xlu0 %v2617_v58, %s1956_s22  ;;  %v2625_v56 = vsub.f32 %v1034_v47, %v1108_v42 }
 0x4ad   :  { %v1041_v7 = vpop.f32.mrf.mxu0 }
 0x4ae   :  { %1493 = vrot.lane.b32.xlu2 %v2619_v48, %s1956_s22 }
 0x4b1   :  { %v1173_v59 = vpop.f32.mrf.mxu2 }
 0x4b2   :  { %v2627_v19 = vadd.f32 %v1222_v35, %v1173_v59  ;;  %v1247_v59 = vmul.f32 %v2576_v17, %v2535_v63 }
 0x4b3   :  { %v1110_v60 = vpop.f32.mrf.mxu1  ;;  %v1229_v50 = vpop.f32.mrf.mxu3 }
 0x4b4   :  { %1291 = vrot.lane.b32.xlu1 %v2627_v19, %s1956_s22  ;;  %1495 = vrot.lane.b32.xlu0 %v2625_v56, %s1956_s22  ;;  %v2633_v2 = vsub.f32 %v1036_v55, %v1110_v60 }
 0x4b5   :  { %v1044_v12 = vpop.f32.mrf.mxu0 }
 0x4b9   :  { %v1175_v4 = vpop.f32.mrf.mxu2 }
 0x4ba   :  { %v2635_v13 = vadd.f32 %v1224_v57, %v1175_v4 }
 0x4bb   :  { %v1113_v61 = vpop.f32.mrf.mxu1  ;;  %v1232_v24 = vpop.f32.mrf.mxu3 }
 0x4bc   :  { %1497 = vrot.lane.b32.xlu1 %v2633_v2, %s1956_s22  ;;  %1293 = vrot.lane.b32.xlu2 %v2635_v13, %s1956_s22  ;;  %v2641_v41 = vsub.f32 %v1039_v51, %v1113_v61 }
 0x4bd   :  { %v1046_v3 = vpop.f32.mrf.mxu0 }
 0x4c1   :  { %v1178_v44 = vpop.f32.mrf.mxu2 }
 0x4c2   :  { %v2643_v62 = vadd.f32 %v1227_v40, %v1178_v44 }
 0x4c3   :  { %v1115_v0 = vpop.f32.mrf.mxu1  ;;  %v1234_v18 = vpop.f32.mrf.mxu3 }
 0x4c4   :  { %1295 = vrot.lane.b32.xlu0 %v2643_v62, %s1956_s22  ;;  %1499 = vrot.lane.b32.xlu2 %v2641_v41, %s1956_s22  ;;  %v2649_v15 = vsub.f32 %v1041_v7, %v1115_v0 }
 0x4c5   :  { %v1049_v53 = vpop.f32.mrf.mxu0 }
 0x4c9   :  { %v1180_v29 = vpop.f32.mrf.mxu2 }
 0x4ca   :  { %v2651_v11 = vadd.f32 %v1229_v50, %v1180_v29  ;;  %v2703_v50 = vmul.f32 %v2599_v31, %v2547_v10  ;;  %v2719_v10 = vmul.f32 %v2576_v17, %v2541_v52  ;;  %v2737_v52 = vld [vmem:[%s3027_s2 + $0x20] sm:$0xff] }
 0x4cb   :  { %v1118_v16 = vpop.f32.mrf.mxu1  ;;  %v1237_v30 = vpop.f32.mrf.mxu3 }
 0x4cc   :  { %1297 = vrot.lane.b32.xlu1 %v2651_v11, %s1956_s22  ;;  %1501 = vrot.lane.b32.xlu0 %v2649_v15, %s1956_s22  ;;  %v2657_v43 = vsub.f32 %v1044_v12, %v1118_v16  ;;  %v1955_v12 = vld [vmem:[%s3025_s1 + $0x10] sm:$0xff] }
 0x4cd   :  { %v1051_v35 = vpop.f32.mrf.mxu0 }
 0x4d1   :  { %v1183_v23 = vpop.f32.mrf.mxu2 }
 0x4d2   :  { %v2659_v33 = vadd.f32 %v1232_v24, %v1183_v23  ;;  %v2728_v23 = vld [vmem:[%s3027_s2 + $0x10] sm:$0xff] }
 0x4d3   :  { %v1120_v8 = vpop.f32.mrf.mxu1  ;;  %v1239_v5 = vpop.f32.mrf.mxu3 }
 0x4d4   :  { %1503 = vrot.lane.b32.xlu1 %v2657_v43, %s1956_s22  ;;  %1299 = vrot.lane.b32.xlu2 %v2659_v33, %s1956_s22  ;;  %v2665_v14 = vsub.f32 %v1046_v3, %v1120_v8 }
 0x4d5   :  { %v1054_v27 = vpop.f32.mrf.mxu0 }
 0x4d9   :  { %v1185_v36 = vpop.f32.mrf.mxu2 }
 0x4da   :  { %v2667_v25 = vadd.f32 %v1234_v18, %v1185_v36 }
 0x4db   :  { %v1123_v34 = vpop.f32.mrf.mxu1  ;;  %v1242_v42 = vpop.f32.mrf.mxu3 }
 0x4dc   :  { %1505 = vrot.lane.b32.xlu2 %v2665_v14, %s1956_s22  ;;  %1301 = vrot.lane.b32.xlu0 %v2667_v25, %s1956_s22  ;;  %v2673_v38 = vsub.f32 %v1049_v53, %v1123_v34 }
 0x4dd   :  { %v1056_v63 = vpop.f32.mrf.mxu0 }
 0x4e1   :  { %v1188_v32 = vpop.f32.mrf.mxu2 }
 0x4e2   :  { %v2675_v26 = vadd.f32 %v1237_v30, %v1188_v32 }
 0x4e3   :  { %v1125_v47 = vpop.f32.mrf.mxu1  ;;  %v1244_v0 = vpop.f32.mrf.mxu3 }
 0x4e4   :  { %1303 = vrot.lane.b32.xlu1 %v2675_v26, %s1956_s22  ;;  %1507 = vrot.lane.b32.xlu0 %v2673_v38, %s1956_s22  ;;  %v2681_v49 = vsub.f32 %v1051_v35, %v1125_v47  ;;  %v2744_v47 = vld [vmem:[%s3027_s2 + $0x18] sm:$0xff] }
 0x4e8   :  { %v1488_v46 = vpop.permute.xlu2 %1487 }
 0x4e9   :  { %v1190_v37 = vpop.f32.mrf.mxu2  ;;  %v1533_v8 = vmul.f32 %v2728_v23, %v1488_v46 }
 0x4ea   :  { %v2683_v55 = vadd.f32 %v1239_v5, %v1190_v37  ;;  %v2753_v37 = vld [vmem:[%s3027_s2 + $0x28] sm:$0xff] }
 0x4eb   :  { %v1128_v57 = vpop.f32.mrf.mxu1 }
 0x4ec   :  { %1509 = vrot.lane.b32.xlu1 %v2681_v49, %s1956_s22  ;;  %1305 = vrot.lane.b32.xlu2 %v2683_v55, %s1956_s22  ;;  %v2693_v4 = vsub.f32 %v1054_v27, %v1128_v57  ;;  %v1248_v27 = vmul.f32 %v2599_v31, %v2549_v39 }
 0x4f0   :  { %v1360_v51 = vpop.permute.xlu2 %1359 }
 0x4f1   :  { %v2691_v40 = vadd.f32 %v1360_v51, %v1247_v59  ;;  %v1193_v60 = vpop.f32.mrf.mxu2 }
 0x4f2   :  { %v2695_v61 = vadd.f32 %v1242_v42, %v1193_v60 }
 0x4f3   :  { %v1130_v7 = vpop.f32.mrf.mxu1 }
 0x4f4   :  { %1511 = vrot.lane.b32.xlu2 %v2693_v4, %s1956_s22  ;;  %1307 = vrot.lane.b32.xlu0 %v2695_v61, %s1956_s22  ;;  %v2709_v29 = vsub.f32 %v1056_v63, %v1130_v7  ;;  %v2766_v63 = vld [vmem:[%s3027_s2 + $0x38] sm:$0xff] }
 0x4f8   :  { %v2705_v44 = vpop.permute.xlu2 %1565 }
 0x4f9   :  { %v1195_v24 = vpop.f32.mrf.mxu2 }
 0x4fa   :  { %v2711_v16 = vadd.f32 %v1244_v0, %v1195_v24 }
 0x4fc   :  { %1309 = vrot.lane.b32.xlu1 %v2711_v16, %s1956_s22  ;;  %1513 = vrot.lane.b32.xlu0 %v2709_v29, %s1956_s22 }
 0x4fe   :  { %v2721_v3 = vpop.permute.xlu1 %1563 }
 0x4ff   :  { %v1611_v18 = vsub.f32 %v2719_v10, %v2721_v3 }
 0x500   :  { %v1288_v36 = vpop.permute.xlu2 %1287 }
 0x501   :  { %v1331_v17 = vmul.f32 %v2737_v52, %v1288_v36 }
 0x504   :  { %1567 = vrot.lane.b32.xlu0 %v1533_v8, %s1957_s23  ;;  %v2775_v8 = vld [vmem:[%s3027_s2 + $0x40] sm:$0xff] }
 0x506   :  { %v1284_v53 = vpop.permute.xlu0 %1283 }
 0x507   :  { %v1329_v30 = vmul.f32 %v2728_v23, %v1284_v53 }
 0x508   :  { %v1494_v46 = vpop.permute.xlu2 %1493 }
 0x509   :  { %1363 = vrot.lane.b32.xlu1 %v1329_v30, %s1957_s23  ;;  %v1536_v57 = vmul.f32 %v2753_v37, %v1494_v46 }
 0x50c   :  { %1367 = vrot.lane.b32.xlu0 %v1331_v17, %s1957_s23  ;;  %v2782_v17 = vld [vmem:[%s3027_s2 + $0x30] sm:$0xff] }
 0x50e   :  { %v1286_v34 = vpop.permute.xlu1 %1285  ;;  %v1490_v32 = vpop.permute.xlu0 %1489 }
 0x50f   :  { %v1330_v35 = vmul.f32 %v2744_v47, %v1286_v34  ;;  %v1534_v5 = vmul.f32 %v2744_v47, %v1490_v32 }
 0x511   :  { %1569 = vrot.lane.b32.xlu1 %v1534_v5, %s1957_s23  ;;  %1365 = vrot.lane.b32.xlu2 %v1330_v35, %s1957_s23 }
 0x514   :  { %1573 = vrot.lane.b32.xlu0 %v1536_v57, %s1957_s23  ;;  %v2792_v57 = vld [vmem:[%s3027_s2 + $0x50] sm:$0xff] }
 0x516   :  { %v1492_v42 = vpop.permute.xlu1 %1491  ;;  %v1362_v59 = vpop.permute.xlu0 %1361 }
 0x517   :  { %v1535_v51 = vmul.f32 %v2737_v52, %v1492_v42  ;;  %v2760_v60 = vadd.f32 %v1362_v59, %v1248_v27  ;;  %v1294_v7 = vpop.permute.xlu2 %1293 }
 0x518   :  { %v1334_v0 = vmul.f32 %v2766_v63, %v1294_v7  ;;  %v2801_v7 = vld [vmem:[%s3027_s2 + $0x58] sm:$0xff] }
 0x519   :  { %1571 = vrot.lane.b32.xlu2 %v1535_v51, %s1957_s23 }
 0x51c   :  { %1373 = vrot.lane.b32.xlu0 %v1334_v0, %s1957_s23 }
 0x51e   :  { %v1290_v24 = vpop.permute.xlu0 %1289 }
 0x51f   :  { %v1332_v39 = vmul.f32 %v2753_v37, %v1290_v24  ;;  %v1500_v31 = vpop.permute.xlu2 %1499 }
 0x520   :  { %v1539_v36 = vmul.f32 %v2775_v8, %v1500_v31  ;;  %v2809_v31 = vld [vmem:[%s3027_s2 + $0x48] sm:$0xff] }
 0x521   :  { %1369 = vrot.lane.b32.xlu1 %v1332_v39, %s1957_s23 }
 0x524   :  { %1579 = vrot.lane.b32.xlu0 %v1539_v36, %s1957_s23 }
 0x526   :  { %v1292_v53 = vpop.permute.xlu1 %1291  ;;  %v1496_v30 = vpop.permute.xlu0 %1495 }
 0x527   :  { %v1333_v34 = vmul.f32 %v2782_v17, %v1292_v53  ;;  %v1537_v32 = vmul.f32 %v2782_v17, %v1496_v30 }
 0x529   :  { %1371 = vrot.lane.b32.xlu2 %v1333_v34, %s1957_s23  ;;  %1575 = vrot.lane.b32.xlu1 %v1537_v32, %s1957_s23 }
 0x52e   :  { %v1498_v35 = vpop.permute.xlu1 %1497  ;;  %v1300_v5 = vpop.permute.xlu2 %1299 }
 0x52f   :  { %v1538_v46 = vmul.f32 %v2766_v63, %v1498_v35  ;;  %v1337_v27 = vmul.f32 %v2792_v57, %v1300_v5 }
 0x531   :  { %1577 = vrot.lane.b32.xlu2 %v1538_v46, %s1957_s23  ;;  %1379 = vrot.lane.b32.xlu0 %v1337_v27, %s1957_s23  ;;  %v2821_v27 = vld [vmem:[%s3027_s2 + $0x70] sm:$0xff] }
 0x536   :  { %v1296_v42 = vpop.permute.xlu0 %1295  ;;  %v1506_v59 = vpop.permute.xlu2 %1505 }
 0x537   :  { %v1335_v51 = vmul.f32 %v2775_v8, %v1296_v42  ;;  %v1542_v0 = vmul.f32 %v2801_v7, %v1506_v59 }
 0x539   :  { %1375 = vrot.lane.b32.xlu1 %v1335_v51, %s1957_s23  ;;  %1585 = vrot.lane.b32.xlu0 %v1542_v0, %s1957_s23  ;;  %v1950_v0 = vld [vmem:[%s3025_s1 + $0x8] sm:$0xff] }
 0x53e   :  { %v1298_v24 = vpop.permute.xlu1 %1297  ;;  %v1502_v39 = vpop.permute.xlu0 %1501 }
 0x53f   :  { %v1336_v36 = vmul.f32 %v2809_v31, %v1298_v24  ;;  %v1540_v53 = vmul.f32 %v2809_v31, %v1502_v39  ;;  %v2830_v24 = vmul.f32 %v1950_v0, %v2521_v1  ;;  %v2835_v39 = vld [vmem:[%s3027_s2 + $0x60] sm:$0xff] }
 0x541   :  { %1377 = vrot.lane.b32.xlu2 %v1336_v36, %s1957_s23  ;;  %1581 = vrot.lane.b32.xlu1 %v1540_v53, %s1957_s23 }
 0x546   :  { %v1504_v30 = vpop.permute.xlu1 %1503  ;;  %v1306_v34 = vpop.permute.xlu2 %1305 }
 0x547   :  { %v1541_v32 = vmul.f32 %v2792_v57, %v1504_v30 }
 0x549   :  { %1583 = vrot.lane.b32.xlu2 %v1541_v32, %s1957_s23  ;;  %v2846_v32 = vld [vmem:[%s3027_s2 + $0x68] sm:$0xff] }
 0x54e   :  { %v1302_v35 = vpop.permute.xlu0 %1301  ;;  %v1512_v5 = vpop.permute.xlu2 %1511 }
 0x54f   :  { %v1338_v46 = vmul.f32 %v2801_v7, %v1302_v35  ;;  %v1545_v42 = vmul.f32 %v2821_v27, %v1512_v5  ;;  %v1340_v5 = vmul.f32 %v2846_v32, %v1306_v34 }
 0x551   :  { %1381 = vrot.lane.b32.xlu1 %v1338_v46, %s1957_s23  ;;  %1591 = vrot.lane.b32.xlu0 %v1545_v42, %s1957_s23  ;;  %v1953_v46 = vld [vmem:[%s3025_s1 + $0x18] sm:$0xff] }
 0x552   :  { %v2856_v42 = vmul.f32 %v1953_v46, %v2521_v1 }
 0x556   :  { %v1304_v59 = vpop.permute.xlu1 %1303  ;;  %v1508_v51 = vpop.permute.xlu0 %1507 }
 0x557   :  { %v1339_v36 = vmul.f32 %v2835_v39, %v1304_v59  ;;  %v1543_v53 = vmul.f32 %v2835_v39, %v1508_v51  ;;  %v1250_v51 = vmul.f32 %v2744_v47, %v2592_v6  ;;  %v1455_v6 = vmul.f32 %v2737_v52, %v2610_v54 }
 0x559   :  { %1383 = vrot.lane.b32.xlu2 %v1339_v36, %s1957_s23  ;;  %1587 = vrot.lane.b32.xlu1 %v1543_v53, %s1957_s23 }
 0x55a   :  { %1670 = vrot.lane.b32.xlu0 %v2830_v24, %s1957_s23 }
 0x55e   :  { %v1510_v30 = vpop.permute.xlu1 %1509 }
 0x55f   :  { %v1544_v35 = vmul.f32 %v2846_v32, %v1510_v30  ;;  %v2865_v30 = vld [vmem:[%s3027_s2 + $0x78] sm:$0xff] }
 0x561   :  { %1589 = vrot.lane.b32.xlu2 %v1544_v35, %s1957_s23 }
 0x562   :  { %1385 = vrot.lane.b32.xlu0 %v1340_v5, %s1957_s23 }
 0x566   :  { %v1308_v59 = vpop.permute.xlu0 %1307 }
 0x567   :  { %v1341_v3 = vmul.f32 %v2821_v27, %v1308_v59 }
 0x569   :  { %1674 = vrot.lane.b32.xlu2 %v2856_v42, %s1957_s23 }
 0x56b   :  { %v1366_v0 = vpop.permute.xlu2 %1365 }
 0x56c   :  { %v1410_v34 = vadd.f32 %v1366_v0, %v1250_v51  ;;  %v2875_v0 = vmul.f32 %v2728_v23, %v2584_v21  ;;  %v1249_v21 = vmul.f32 %v2728_v23, %v2579_v45  ;;  %v1454_v45 = vmul.f32 %v2744_v47, %v2594_v22 }
 0x56d   :  { %v1253_v23 = vmul.f32 %v2782_v17, %v2625_v56  ;;  %v3031_v22 = vsub.f32 %v2703_v50, %v2705_v44 }
 0x56e   :  { %v1310_v36 = vpop.permute.xlu1 %1309  ;;  %v1514_v53 = vpop.permute.xlu0 %1513 }
 0x56f   :  { %v1342_v35 = vmul.f32 %v2865_v30, %v1310_v36  ;;  %v1546_v5 = vmul.f32 %v2865_v30, %v1514_v53  ;;  %v2881_v36 = vmul.f32 %v1955_v12, %v2521_v1  ;;  %v1627_v53 = vsel %vm310_vm0, %v1611_v18, 0.0 }
 0x570   :  { %v1251_v12 = vmul.f32 %v2737_v52, %v2607_v28  ;;  %v1634_v47 = vsel %vm310_vm0, %v3031_v22, 0.0 }
 0x571   :  { %1389 = vrot.lane.b32.xlu2 %v1342_v35, %s1957_s23  ;;  %1593 = vrot.lane.b32.xlu1 %v1546_v5, %s1957_s23 }
 0x573   :  { %v1572_v46 = vpop.permute.xlu2 %1571 }
 0x574   :  { %v1615_v51 = vsub.f32 %v1455_v6, %v1572_v46 }
 0x576   :  { %v1628_v54 = vsel %vm310_vm0, %v1615_v51, 0.0  ;;  %v1568_v35 = vpop.permute.xlu0 %1567  ;;  %v1423_v51 = vsel %vm310_vm0, %v2691_v40, 0.0 }
 0x577   :  { %v1629_v5 = vadd.f32 %v1628_v54, %v1627_v53  ;;  %v1613_v6 = vsub.f32 %v2875_v0, %v1568_v35  ;;  %v1456_v35 = vmul.f32 %v2753_v37, %v2617_v58 }
 0x579   :  { %1672 = vrot.lane.b32.xlu1 %v2881_v36, %s1957_s23 }
 0x57b   :  { %v1364_v46 = vpop.permute.xlu1 %1363 }
 0x57c   :  { %v1409_v1 = vadd.f32 %v1364_v46, %v1249_v21 }
 0x57e   :  { %v1368_v10 = vpop.permute.xlu0 %1367  ;;  %v1437_v40 = vsel %vm310_vm0, %v1409_v1, 0.0  ;;  %v1254_v1 = vmul.f32 %v2766_v63, %v2633_v2  ;;  %v1459_v2 = vmul.f32 %v2775_v8, %v2643_v62 }
 0x57f   :  { %v1411_v18 = vadd.f32 %v1368_v10, %v1251_v12 }
 0x581   :  { %v1424_v0 = vsel %vm310_vm0, %v1411_v18, 0.0  ;;  %1387 = vrot.lane.b32.xlu1 %v1341_v3, %s1957_s23  ;;  %v1458_v18 = vmul.f32 %v2766_v63, %v2635_v13  ;;  %v1252_v13 = vmul.f32 %v2753_v37, %v2619_v48  ;;  %v1430_v63 = vsel %vm310_vm0, %v2760_v60, 0.0 }
 0x582   :  { %v2900_v53 = vadd.f32 %v1424_v0, %v1423_v51  ;;  %v1457_v48 = vmul.f32 %v2782_v17, %v2627_v19  ;;  %v1256_v37 = vmul.f32 %v2809_v31, %v2649_v15  ;;  %v1641_v60 = vsel %vm310_vm0, %v1613_v6, 0.0 }
 0x583   :  { %v1570_v28 = vpop.permute.xlu1 %1569  ;;  %v1372_v52 = vpop.permute.xlu2 %1371  ;;  %v1461_v19 = vmul.f32 %v2792_v57, %v2659_v33 }
 0x584   :  { %v1614_v54 = vsub.f32 %v1454_v45, %v1570_v28  ;;  %v1413_v59 = vadd.f32 %v1372_v52, %v1253_v23  ;;  %v1444_v28 = vsel %vm310_vm0, %v1410_v34, 0.0 }
 0x586   :  { %v1438_v21 = vsel %vm310_vm0, %v1413_v59, 0.0  ;;  %v1574_v46 = vpop.permute.xlu0 %1573  ;;  %v1648_v0 = vsel %vm310_vm0, %v1614_v54, 0.0 }
 0x587   :  { %v1439_v12 = vadd.f32 %v1438_v21, %v1437_v40  ;;  %v1616_v10 = vsub.f32 %v1456_v35, %v1574_v46 }
 0x589   :  { %v1635_v56 = vsel %vm310_vm0, %v1616_v10, 0.0 }
 0x58a   :  { %v2915_v3 = vadd.f32 %v1635_v56, %v1634_v47 }
 0x58b   :  { %v1578_v58 = vpop.permute.xlu2 %1577 }
 0x58c   :  { %v1618_v51 = vsub.f32 %v1458_v18, %v1578_v58 }
 0x58e   :  { %v1649_v45 = vsel %vm310_vm0, %v1618_v51, 0.0  ;;  %v1374_v23 = vpop.permute.xlu0 %1373 }
 0x58f   :  { %v1650_v50 = vadd.f32 %v1649_v45, %v1648_v0  ;;  %v1414_v44 = vadd.f32 %v1374_v23, %v1254_v1 }
 0x591   :  { %v1445_v52 = vsel %vm310_vm0, %v1414_v44, 0.0 }
 0x592   :  { %v2925_v59 = vadd.f32 %v1445_v52, %v1444_v28 }
 0x593   :  { %v1370_v35 = vpop.permute.xlu1 %1369 }
 0x594   :  { %v1412_v40 = vadd.f32 %v1370_v35, %v1252_v13  ;;  %v1255_v13 = vmul.f32 %v2775_v8, %v2641_v41  ;;  %v1259_v41 = vmul.f32 %v2835_v39, %v2673_v38  ;;  %v1258_v38 = vmul.f32 %v2801_v7, %v2665_v14 }
 0x595   :  { %v1262_v14 = vmul.f32 %v2865_v30, %v2709_v29 }
 0x596   :  { %v1431_v54 = vsel %vm310_vm0, %v1412_v40, 0.0  ;;  %v1580_v21 = vpop.permute.xlu0 %1579 }
 0x597   :  { %v1432_v46 = vadd.f32 %v1431_v54, %v1430_v63  ;;  %v1619_v34 = vsub.f32 %v1459_v2, %v1580_v21 }
 0x599   :  { %v1630_v10 = vsel %vm310_vm0, %v1619_v34, 0.0 }
 0x59a   :  { %v2935_v22 = vadd.f32 %v1630_v10, %v1629_v5  ;;  %v1257_v5 = vmul.f32 %v2792_v57, %v2657_v43  ;;  %v1462_v43 = vmul.f32 %v2801_v7, %v2667_v25 }
 0x59b   :  { %v1576_v47 = vpop.permute.xlu1 %1575  ;;  %v1378_v62 = vpop.permute.xlu2 %1377 }
 0x59c   :  { %v1617_v56 = vsub.f32 %v1457_v48, %v1576_v47  ;;  %v1416_v18 = vadd.f32 %v1378_v62, %v1256_v37 }
 0x59e   :  { %v1642_v58 = vsel %vm310_vm0, %v1617_v56, 0.0  ;;  %v1433_v51 = vsel %vm310_vm0, %v1416_v18, 0.0  ;;  %v1465_v56 = vmul.f32 %v2821_v27, %v2695_v61 }
 0x59f   :  { %v1643_v1 = vadd.f32 %v1642_v58, %v1641_v60  ;;  %v2944_v0 = vadd.f32 %v1433_v51, %v1432_v46 }
 0x5a3   :  { %v1380_v15 = vpop.permute.xlu0 %1379  ;;  %v1584_v17 = vpop.permute.xlu2 %1583 }
 0x5a4   :  { %v1417_v45 = vadd.f32 %v1380_v15, %v1257_v5  ;;  %v1621_v23 = vsub.f32 %v1461_v19, %v1584_v17  ;;  %v1463_v15 = vmul.f32 %v2835_v39, %v2675_v26  ;;  %v1260_v39 = vmul.f32 %v2846_v32, %v2681_v49 }
 0x5a6   :  { %v1440_v44 = vsel %vm310_vm0, %v1417_v45, 0.0  ;;  %v1644_v6 = vsel %vm310_vm0, %v1621_v23, 0.0 }
 0x5a7   :  { %v2952_v28 = vadd.f32 %v1440_v44, %v1439_v12  ;;  %v1645_v52 = vadd.f32 %v1644_v6, %v1643_v1  ;;  %v1460_v12 = vmul.f32 %v2809_v31, %v2651_v11 }
 0x5ab   :  { %v1376_v35 = vpop.permute.xlu1 %1375  ;;  %v1586_v40 = vpop.permute.xlu0 %1585 }
 0x5ac   :  { %v1415_v33 = vadd.f32 %v1376_v35, %v1255_v13  ;;  %v1622_v57 = vsub.f32 %v1462_v43, %v1586_v40 }
 0x5ae   :  { %v1426_v2 = vsel %vm310_vm0, %v1415_v33, 0.0  ;;  %v1651_v63 = vsel %vm310_vm0, %v1622_v57, 0.0 }
 0x5af   :  { %v1427_v54 = vadd.f32 %v1426_v2, %v2900_v53  ;;  %v1652_v21 = vadd.f32 %v1651_v63, %v1650_v50  ;;  %v1464_v53 = vmul.f32 %v2846_v32, %v2683_v55  ;;  %v1261_v32 = vmul.f32 %v2821_v27, %v2693_v4 }
 0x5b3   :  { %v1582_v8 = vpop.permute.xlu1 %1581  ;;  %v1384_v46 = vpop.permute.xlu2 %1383 }
 0x5b4   :  { %v1620_v25 = vsub.f32 %v1460_v12, %v1582_v8  ;;  %v1419_v34 = vadd.f32 %v1384_v46, %v1259_v41 }
 0x5b6   :  { %v1637_v10 = vsel %vm310_vm0, %v1620_v25, 0.0  ;;  %v1428_v48 = vsel %vm310_vm0, %v1419_v34, 0.0 }
 0x5b7   :  { %v1638_v37 = vadd.f32 %v1637_v10, %v2915_v3  ;;  %v1429_v47 = vadd.f32 %v1428_v48, %v1427_v54 }
 0x5b9   :  { %v1660_v46 = vadd.f32 %v2527_v9, %v1429_v47 }
 0x5bb   :  { %v1590_v50 = vpop.permute.xlu2 %1589 }
 0x5bc   :  { %v1624_v62 = vsub.f32 %v1464_v53, %v1590_v50 }
 0x5be   :  { %v1639_v11 = vsel %vm310_vm0, %v1624_v62, 0.0 }
 0x5bf   :  { %v1640_v31 = vadd.f32 %v1639_v11, %v1638_v37 }
 0x5c3   :  { %v1382_v18 = vpop.permute.xlu1 %1381  ;;  %v1592_v60 = vpop.permute.xlu0 %1591 }
 0x5c4   :  { %v1418_v58 = vadd.f32 %v1382_v18, %v1258_v38  ;;  %v1625_v51 = vsub.f32 %v1465_v56, %v1592_v60  ;;  %v1675_v3 = vpop.permute.xlu2 %1674 }
 0x5c6   :  { %v1447_v1 = vsel %vm310_vm0, %v1418_v58, 0.0  ;;  %v1646_v55 = vsel %vm310_vm0, %v1625_v51, 0.0 }
 0x5c7   :  { %v1448_v5 = vadd.f32 %v1447_v1, %v2925_v59  ;;  %v1647_v19 = vadd.f32 %v1646_v55, %v1645_v52 }
 0x5cb   :  { %v1588_v17 = vpop.permute.xlu1 %1587 }
 0x5cc   :  { %v1623_v61 = vsub.f32 %v1463_v15, %v1588_v17  ;;  %v1671_v7 = vpop.permute.xlu0 %1670  ;;  %v1390_v45 = vpop.permute.xlu2 %1389 }
 0x5cd   :  { %v1681_v23 = vadd.f32 %v1671_v7, %v1640_v31  ;;  %v1422_v44 = vadd.f32 %v1390_v45, %v1262_v14 }
 0x5ce   :  { %v1632_v6 = vsel %vm310_vm0, %v1623_v61, 0.0 }
 0x5cf   :  { %v1633_v13 = vadd.f32 %v1632_v6, %v2935_v22  ;;  %v1449_v43 = vsel %vm310_vm0, %v1422_v44, 0.0  ;;  %1690 = vrot.lane.b32.xlu1 %v1681_v23, %s1956_s22  ;;  %v1466_v22 = vmul.f32 %v2865_v30, %v2711_v16 }
 0x5d0   :  { %v1450_v59 = vadd.f32 %v1449_v43, %v1448_v5 }
 0x5d1   :  { %v1680_v26 = vadd.f32 %v2589_v20, %v1633_v13 }
 0x5d2   :  { %v1663_v9 = vadd.f32 %v2856_v42, %v1450_v59 }
 0x5d3   :  { %1688 = vrot.lane.b32.xlu0 %v1680_v26, %s1956_s22 }
 0x5d4   :  { %v1386_v29 = vpop.permute.xlu0 %1385 }
 0x5d5   :  { %v1420_v52 = vadd.f32 %v1386_v29, %v1260_v39 }
 0x5d7   :  { %v1435_v35 = vsel %vm310_vm0, %v1420_v52, 0.0 }
 0x5d8   :  { %v1436_v40 = vadd.f32 %v1435_v35, %v2944_v0 }
 0x5da   :  { %v1661_v30 = vadd.f32 %v2830_v24, %v1436_v40 }
 0x5e3   :  { %v1594_v33 = vpop.permute.xlu1 %1593 }
 0x5e4   :  { %v1626_v57 = vsub.f32 %v1466_v22, %v1594_v33 }
 0x5e6   :  { %v1653_v2 = vsel %vm310_vm0, %v1626_v57, 0.0 }
 0x5e7   :  { %v1654_v63 = vadd.f32 %v1653_v2, %v1652_v21 }
 0x5e9   :  { %v1683_v20 = vadd.f32 %v1675_v3, %v1654_v63 }
 0x5eb   :  { %v1673_v54 = vpop.permute.xlu1 %1672  ;;  %1694 = vrot.lane.b32.xlu0 %v1683_v20, %s1956_s22 }
 0x5ec   :  { %v1682_v49 = vadd.f32 %v1673_v54, %v1647_v19 }
 0x5ee   :  { %1692 = vrot.lane.b32.xlu2 %v1682_v49, %s1956_s22 }
 0x5f3   :  { %v1388_v12 = vpop.permute.xlu1 %1387 }
 0x5f4   :  { %v1421_v0 = vadd.f32 %v1388_v12, %v1261_v32 }
 0x5f6   :  { %v1442_v41 = vsel %vm310_vm0, %v1421_v0, 0.0 }
 0x5f7   :  { %v1443_v16 = vadd.f32 %v1442_v41, %v2952_v28 }
 0x5f9   :  { %v1662_v27 = vadd.f32 %v2881_v36, %v1443_v16 }
 0x641   :  { %v1691_v8 = vpop.permute.xlu1 %1690 }
 0x642   :  { %v1701_v21 = vsel %vm310_vm0, %v1661_v30, %v1691_v8 }
 0x643   :  { %1705 = vst.msk [vmem:[%s3030_s5 + $0x8] sm:$0xff] %vm632_vm2, %v1701_v21 }
 0x645   :  { %v1689_v25 = vpop.permute.xlu0 %1688 }
 0x646   :  { %v1700_v4 = vsel %vm310_vm0, %v1660_v46, %v1689_v25 }
 0x647   :  { %1704 = vst.msk [vmem:[%s3030_s5] sm:$0xff] %vm632_vm2, %v1700_v4 }
 0x648   :  { %v1693_v24 = vpop.permute.xlu2 %1692 }
 0x649   :  { %v1702_v28 = vsel %vm310_vm0, %v1662_v27, %v1693_v24 }
 0x64a   :  { %1706 = vst.msk [vmem:[%s3030_s5 + $0x10] sm:$0xff] %vm632_vm2, %v1702_v28 }
 0x65d   :  { %v1695_v34 = vpop.permute.xlu0 %1694 }
 0x65e   :  { %v1703_v10 = vsel %vm310_vm0, %v1663_v9, %v1695_v34 }
 0x65f   :  { %1707 = vst.msk [vmem:[%s3030_s5 + $0x18] sm:$0xff] %vm632_vm2, %v1703_v10 }

</bundles_post_ra>
